<compile_context>
chip_gen: v7x
topology: tpu7x:2x2x1
jax: 0.10.0
libtpu: 0.0.40
codegen_flags: <defaults>
</compile_context>

<pallas_src>
import math

import jax
import jax.numpy as jnp
from jax.experimental import pallas as pl
from jax.experimental.pallas import tpu as pltpu


# ---------------------------------------------------------------------------
# helpers
# ---------------------------------------------------------------------------
def _round_up(x, m):
    return (x + m - 1) // m * m


def _padded_block_bytes(shape, itemsize):
    """VMEM footprint of a block, honouring the (8, 128) sublane/lane tiling."""
    shape = tuple(int(v) for v in shape)
    if len(shape) == 1:
        return _round_up(shape[0], 128) * 8 * itemsize
    lead = 1
    for v in shape[:-2]:
        lead *= v
    return lead * _round_up(shape[-2], 8) * _round_up(shape[-1], 128) * itemsize


def _vmem_capacity_bytes():
    """Per-core VMEM capacity; conservative fallback = 64 MiB (v7x per-TC)."""
    try:
        return int(pltpu.get_tpu_info().vmem_capacity_bytes)
    except Exception:
        return 64 << 20


def _vmem_need_bytes(THo, Wo, Cin, Cout_p, k, s, q_max,
                     x_itemsize, w_itemsize, o_itemsize):
    """Padded VMEM footprint of all blocks for a given output-row tile."""
    BH, BW = THo + q_max, Wo + q_max
    in_blk = _padded_block_bytes((s * s * BH, BW, Cin), x_itemsize)
    w_blk = _padded_block_bytes((k * k, Cin, Cout_p), w_itemsize)
    b_blk = _padded_block_bytes((1, Cout_p), 4)
    out_blk = _padded_block_bytes((THo * Wo, Cout_p), o_itemsize)
    acc_blk = _padded_block_bytes((THo * Wo, Cout_p), 4)
    # Inputs/outputs are double-buffered by the pipeliner; weight/bias blocks
    # also get two buffers even though their DMA fires only once.
    return 2 * (in_blk + out_blk + w_blk + b_blk) + acc_blk


def _pick_tile_ho(N, Ho, Wo, Cin, Cout_p, k, s, q_max,
                  x_itemsize, w_itemsize, o_itemsize, budget_bytes):
    """Largest divisor of Ho whose total padded VMEM footprint fits the budget."""
    best = 1
    for cand in range(1, Ho + 1):
        if Ho % cand:
            continue
        if N == 1 and Ho > 1 and cand == Ho:
            continue  # keep >= 2 grid programs so both v7x TensorCores get work
        need = _vmem_need_bytes(cand, Wo, Cin, Cout_p, k, s, q_max,
                                x_itemsize, w_itemsize, o_itemsize)
        if need <= budget_bytes:
            best = cand
    return best


# ---------------------------------------------------------------------------
# kernel
# ---------------------------------------------------------------------------
def _conv_kernel_factory(THo, Wo, Cin, Cout_p, k, s, d, BH, BW):
    """Direct conv over one (batch, output-row-tile) grid point.

    All in-kernel reads are static contiguous slices: the wrapper already
    split the padded input into stride-phase planes / row bands.
    """

    def kernel(x_ref, w_ref, b_ref, o_ref, acc_ref):
        # x_ref : (1, 1, s*s*BH, BW, Cin) phase+band split input rows of this tile
        # w_ref : (k*k, Cin, Cout_p)      taps leading, channels on lanes
        # b_ref : (1, Cout_p)             zero-padded bias, f32
        # o_ref : (1, 1, THo*Wo, Cout_p)  lane-dense output tile
        # acc_ref: VMEM (THo*Wo, Cout_p)  f32 scratch accumulator
        acc_ref[...] = jnp.broadcast_to(b_ref[...], (THo * Wo, Cout_p))

        for kh in range(k):                       # static, unrolled (k small)
            qh, rh = divmod(kh * d, s)
            for kw in range(k):
                qw, rw = divmod(kw * d, s)
                plane = (rh * s + rw) * BH
                patch = x_ref[0, 0,
                              plane + qh:plane + qh + THo,
                              qw:qw + Wo, :]        # (THo, Wo, Cin), contiguous
                acc_ref[...] += jnp.dot(
                    patch.reshape(THo * Wo, Cin),
                    w_ref[kh * k + kw],
                    preferred_element_type=jnp.float32)

        o_ref[...] = acc_ref[...].reshape(1, 1, THo * Wo, Cout_p).astype(o_ref.dtype)

    return kernel


# ---------------------------------------------------------------------------
# wrapper
# ---------------------------------------------------------------------------
def conv2d_pallas(x_nchw, weight_oihw, bias, stride=1, padding=0, dilation=1,
                  groups=1, tile_ho=None):
    """Forward conv2d matching F.conv2d(x, w, b, stride, padding, dilation)."""
    if groups != 1:
        # TODO(synk): grouped convolution not implemented (module default is 1).
        raise NotImplementedError("conv2d_pallas only supports groups == 1")

    s, p, d = int(stride), int(padding), int(dilation)
    N, Cin, H, W = x_nchw.shape
    Cout, Cin_w, k, k2 = weight_oihw.shape
    assert Cin_w == Cin and k == k2, "weight shape mismatch"

    Ho = (H + 2 * p - d * (k - 1) - 1) // s + 1
    Wo = (W + 2 * p - d * (k - 1) - 1) // s + 1
    assert Ho > 0 and Wo > 0, "empty output"

    dtype = x_nchw.dtype
    x_itemsize = jnp.dtype(dtype).itemsize
    w_itemsize = jnp.dtype(weight_oihw.dtype).itemsize

    # Lane-dense output / MXU columns: pad Cout up to a multiple of 128.
    # (No-op for real layers with Cout % 128 == 0; for tiny Cout it trades a
    # larger writeback for unmasked full-lane stores.)
    Cout_p = _round_up(Cout, 128)

    q_max = ((k - 1) * d) // s            # halo rows/cols per phase plane

    cap = _vmem_capacity_bytes()
    if tile_ho is None:
        budget = int(0.55 * cap)          # leave headroom for internal scratch
        tile_ho = _pick_tile_ho(N, Ho, Wo, Cin, Cout_p, k, s, q_max,
                                x_itemsize, w_itemsize, x_itemsize, budget)
    assert Ho % tile_ho == 0, "tile_ho must divide Ho"
    n_ho = Ho // tile_ho
    BH, BW = tile_ho + q_max, Wo + q_max

    # ---- wrapper-side layout plumbing (plain XLA) ---------------------------
    # NCHW -> NHWC (channels ride the 128-lane axis) + zero padding.
    x = jnp.transpose(x_nchw, (0, 2, 3, 1))
    if p:
        x = jnp.pad(x, ((0, 0), (p, p), (p, p), (0, 0)))
    Hp, Wp = H + 2 * p, W + 2 * p

    # Split into s*s stride-phase planes and overlapping output-row bands so
    # every in-kernel tap read is a static contiguous slice and only
    # O(tile rows) of input is resident in VMEM per grid step.
    # band[n, h, rh, rw, i, j, c] = xp[n, (h*THo + i)*s + rh, j*s + rw, c]
    row_idx = ((jnp.arange(n_ho)[:, None, None] * tile_ho
                + jnp.arange(BH)[None, None, :]) * s
               + jnp.arange(s)[None, :, None])                 # (n_ho, s, BH)
    row_idx = jnp.clip(row_idx, 0, Hp - 1)      # clipped entries are never read
    col_idx = jnp.clip(jnp.arange(BW)[None, :] * s
                       + jnp.arange(s)[:, None], 0, Wp - 1)    # (s, BW)
    xb = x[:, row_idx, :, :]                    # (N, n_ho, s, BH, Wp, Cin)
    xb = xb[:, :, :, :, col_idx, :]             # (N, n_ho, s, BH, s, BW, Cin)
    xb = jnp.transpose(xb, (0, 1, 2, 4, 3, 5, 6))   # (N, n_ho, s, s, BH, BW, Cin)
    xb = xb.reshape(N, n_ho, s * s * BH, BW, Cin)

    # weight OIHW -> (k*k, Cin, Cout_p); bias -> (1, Cout_p) f32.
    w = jnp.transpose(weight_oihw, (2, 3, 1, 0)).reshape(k * k, Cin, Cout)
    b = jnp.reshape(bias, (1, Cout)).astype(jnp.float32)
    if Cout_p != Cout:
        w = jnp.pad(w, ((0, 0), (0, 0), (0, Cout_p - Cout)))
        b = jnp.pad(b, ((0, 0), (0, Cout_p - Cout)))
    # TODO(synk): the original module re-adds a nonzero bias once per
    # (channel-group, tap) sub-conv; standard conv semantics (added once) are
    # used here, which is identical for the module default bias=False.

    need = _vmem_need_bytes(tile_ho, Wo, Cin, Cout_p, k, s, q_max,
                            x_itemsize, w_itemsize, x_itemsize)
    vmem_limit = max(min(max(need + (8 << 20), 32 << 20), cap - (2 << 20)),
                     need + (1 << 20))

    kernel = _conv_kernel_factory(tile_ho, Wo, Cin, Cout_p, k, s, d, BH, BW)

    out = pl.pallas_call(
        kernel,
        out_shape=jax.ShapeDtypeStruct((N, n_ho, tile_ho * Wo, Cout_p), dtype),
        grid_spec=pltpu.PrefetchScalarGridSpec(
            num_scalar_prefetch=0,
            grid=(N, n_ho),
            in_specs=[
                pl.BlockSpec((1, 1, s * s * BH, BW, Cin),
                             lambda n, h: (n, h, 0, 0, 0)),
                pl.BlockSpec((k * k, Cin, Cout_p), lambda n, h: (0, 0, 0)),
                pl.BlockSpec((1, Cout_p), lambda n, h: (0, 0)),
            ],
            out_specs=pl.BlockSpec((1, 1, tile_ho * Wo, Cout_p),
                                   lambda n, h: (n, h, 0, 0)),
            scratch_shapes=[pltpu.VMEM((tile_ho * Wo, Cout_p), jnp.float32)],
        ),
        compiler_params=pltpu.CompilerParams(
            dimension_semantics=("parallel", "parallel"),
            vmem_limit_bytes=int(vmem_limit),
        ),
    )(xb, w, b)

    # (N, n_ho, THo*Wo, Cout_p) -> NHWC (drop lane padding) -> NCHW.
    out = out.reshape(N, Ho, Wo, Cout_p)[..., :Cout]
    return jnp.transpose(out, (0, 3, 1, 2))


# ---------------------------------------------------------------------------
# forward-only module mirror
# ---------------------------------------------------------------------------
class Conv2dPallas:
    """Forward-only Pallas mirror of the PyTorch Conv2d module."""

    def __init__(self, in_channels, out_channels, kernel_size, stride=1,
                 padding=0, dilation=1, groups=1, bias=False, lr=0.1,
                 momentum=0.9, use_relu=True, relu_inplace=True,
                 low_precision=False, key=None):
        self.in_channels = in_channels
        self.out_channels = out_channels
        self.kernel_size = kernel_size
        self.stride = stride
        self.padding = padding
        self.dilation = dilation
        self.groups = groups
        self.lp = low_precision
        if self.lp:
            self.w_man, self.w_exp = 2, 5
            self.g_man, self.g_exp = 2, 5
            self.x_man, self.x_exp = 2, 5
            self.y_man, self.y_exp = 10, 5
        self.c_tc = 8

        fan_in = out_channels * kernel_size * kernel_size
        weight_std = math.sqrt(2.0 / fan_in)
        key = jax.random.PRNGKey(0) if key is None else key
        wk, bk = jax.random.split(key)
        self.weight = weight_std * jax.random.normal(
            wk, (out_channels, in_channels, kernel_size, kernel_size),
            dtype=jnp.float32)
        if bias:
            self.bias = weight_std * jax.random.normal(
                bk, (out_channels,), dtype=jnp.float32)
        else:
            self.bias = jnp.zeros((out_channels,), dtype=jnp.float32)

        self.w_grad = jnp.zeros_like(self.weight)
        self.w_vel = jnp.zeros_like(self.weight)
        self.momentum = momentum
        self.lr = lr
        # TODO(synk): low-precision float_quantize (lp=True) of weights/inputs/
        # partial sums, feed_backward and weight_update are not implemented;
        # the forward pass is full precision.

    def __call__(self, x_nchw):
        self.input = x_nchw
        self.out = conv2d_pallas(x_nchw, self.weight, self.bias,
                                 stride=self.stride, padding=self.padding,
                                 dilation=self.dilation, groups=self.groups)
        return self.out


# ---------------------------------------------------------------------------
# reference + tests
# ---------------------------------------------------------------------------
def _reference_conv(x, w, b, stride, padding, dilation, groups):
    out = jax.lax.conv_general_dilated(
        x, w,
        window_strides=(stride, stride),
        padding=[(padding, padding), (padding, padding)],
        rhs_dilation=(dilation, dilation),
        dimension_numbers=("NCHW", "OIHW", "NCHW"),
        feature_group_count=groups)
    return out + b.reshape(1, -1, 1, 1)


if __name__ == "__main__":
    key = jax.random.PRNGKey(0)
    kx, kw, kb = jax.random.split(key, 3)

    N, Cin, H, W = 2, 4, 16, 16
    Cout, ksz = 8, 3
    x = jax.random.normal(kx, (N, Cin, H, W), dtype=jnp.float32)
    w = 0.1 * jax.random.normal(kw, (Cout, Cin, ksz, ksz), dtype=jnp.float32)
    b = 0.1 * jax.random.normal(kb, (Cout,), dtype=jnp.float32)

    # Case 1: stride 1, padding 1, bias, automatic output-row tiling.
    out1 = jax.block_until_ready(conv2d_pallas(x, w, b, stride=1, padding=1))
    ref1 = _reference_conv(x, w, b, 1, 1, 1, 1)
    assert out1.shape == (N, Cout, 16, 16), out1.shape
    assert jnp.allclose(out1, ref1, atol=3e-2, rtol=3e-2), "case 1 mismatch"

    # Case 2: stride 2, padding 1, forced multi-tile (exercises phase planes
    # and the (N, n_ho) grid with halo bands).
    out2 = jax.block_until_ready(
        conv2d_pallas(x, w, b, stride=2, padding=1, tile_ho=4))
    ref2 = _reference_conv(x, w, b, 2, 1, 1, 1)
    assert out2.shape == (N, Cout, 8, 8), out2.shape
    assert jnp.allclose(out2, ref2, atol=3e-2, rtol=3e-2), "case 2 mismatch"

    # Case 3: stride 2 + dilation 2 (mixed stride/dilation phase arithmetic).
    out3 = jax.block_until_ready(
        conv2d_pallas(x, w, b, stride=2, padding=2, dilation=2))
    ref3 = _reference_conv(x, w, b, 2, 2, 2, 1)
    assert out3.shape == ref3.shape, (out3.shape, ref3.shape)
    assert jnp.allclose(out3, ref3, atol=3e-2, rtol=3e-2), "case 3 mismatch"

    # Module-style usage (bias=False path, mirrors the PyTorch defaults).
    conv = Conv2dPallas(Cin, Cout, ksz, stride=1, padding=1, bias=False)
    out4 = jax.block_until_ready(conv(x))
    ref4 = _reference_conv(x, conv.weight, conv.bias, 1, 1, 1, 1)
    assert out4.shape == (N, Cout, 16, 16), out4.shape
    assert jnp.allclose(out4, ref4, atol=3e-2, rtol=3e-2), "module mismatch"

    print("KERNEL_OK")
</pallas_src>

<mosaic_0001>
module attributes {stable_mosaic.version = 11 : i64} {
  func.func @kernel(%arg0: i32, %arg1: i32, %arg2: memref<1x1x18x18x4xf32, #tpu.memory_space<vmem>>, %arg3: memref<9x4x128xf32, #tpu.memory_space<vmem>>, %arg4: memref<1x128xf32, #tpu.memory_space<vmem>>, %arg5: memref<1x1x256x128xf32, #tpu.memory_space<vmem>>, %arg6: memref<256x128xf32, #tpu.memory_space<vmem>>) attributes {dimension_semantics = [#tpu.dimension_semantics<parallel>, #tpu.dimension_semantics<parallel>], iteration_bounds = array<i64: 2, 1>, scalar_prefetch = 0 : i64, scratch_operands = 1 : i64, tpu.core_type = #tpu.core_type<tc>, window_params = [{transform_indices = @transform_0, window_bounds = array<i64: 1, 1, 18, 18, 4>}, {pipeline_mode = #tpu.pipeline_mode<synchronous>, transform_indices = @transform_1, window_bounds = array<i64: 9, 4, 128>}, {pipeline_mode = #tpu.pipeline_mode<synchronous>, transform_indices = @transform_2, window_bounds = array<i64: 1, 128>}, {transform_indices = @transform_3, window_bounds = array<i64: 1, 1, 256, 128>}]} {
    %c0 = arith.constant 0 : index
    %c0_0 = arith.constant 0 : index
    %0 = vector.load %arg4[%c0, %c0_0] : memref<1x128xf32, #tpu.memory_space<vmem>>, vector<1x128xf32>
    %1 = vector.shape_cast %0 : vector<1x128xf32> to vector<1x128xf32>
    %2 = vector.broadcast %1 : vector<1x128xf32> to vector<256x128xf32>
    %c0_1 = arith.constant 0 : index
    %c0_2 = arith.constant 0 : index
    %3 = vector.load %arg6[%c0_1, %c0_2] : memref<256x128xf32, #tpu.memory_space<vmem>>, vector<256x128xf32>
    tpu.vector_store %arg6[%c0_1, %c0_2], %2 {strides = array<i32>} : memref<256x128xf32, #tpu.memory_space<vmem>>, vector<256x128xf32>,
    %c0_3 = arith.constant 0 : index
    %c0_4 = arith.constant 0 : index
    %c0_5 = arith.constant 0 : index
    %c0_6 = arith.constant 0 : index
    %c0_7 = arith.constant 0 : index
    %4 = vector.load %arg2[%c0_3, %c0_4, %c0_5, %c0_6, %c0_7] : memref<1x1x18x18x4xf32, #tpu.memory_space<vmem>>, vector<1x1x16x16x4xf32>
    %5 = vector.shape_cast %4 : vector<1x1x16x16x4xf32> to vector<16x16x4xf32>
    %c0_8 = arith.constant 0 : index
    %c0_9 = arith.constant 0 : index
    %6 = vector.load %arg6[%c0_8, %c0_9] : memref<256x128xf32, #tpu.memory_space<vmem>>, vector<256x128xf32>
    %7 = vector.shape_cast %5 : vector<16x16x4xf32> to vector<256x4xf32>
    %c0_10 = arith.constant 0 : index
    %c0_11 = arith.constant 0 : index
    %c0_12 = arith.constant 0 : index
    %8 = vector.load %arg3[%c0_10, %c0_11, %c0_12] : memref<9x4x128xf32, #tpu.memory_space<vmem>>, vector<1x4x128xf32>
    %9 = vector.shape_cast %8 : vector<1x4x128xf32> to vector<4x128xf32>
    %cst = arith.constant dense<0.000000e+00> : vector<256x128xf32>
    %10 = tpu.matmul %7, %9, %cst {dimension_numbers = #tpu.dot_dimension_numbers<[1], [0], [0], [1], [0, 0, 1, 1], [], []>} : vector<256x4xf32>, vector<4x128xf32>, vector<256x128xf32> -> vector<256x128xf32>
    %11 = arith.addf %6, %10 : vector<256x128xf32>
    %c0_13 = arith.constant 0 : index
    %c0_14 = arith.constant 0 : index
    %12 = vector.load %arg6[%c0_13, %c0_14] : memref<256x128xf32, #tpu.memory_space<vmem>>, vector<256x128xf32>
    tpu.vector_store %arg6[%c0_13, %c0_14], %11 {strides = array<i32>} : memref<256x128xf32, #tpu.memory_space<vmem>>, vector<256x128xf32>,
    %c0_15 = arith.constant 0 : index
    %c0_16 = arith.constant 0 : index
    %c0_17 = arith.constant 0 : index
    %c1 = arith.constant 1 : index
    %c0_18 = arith.constant 0 : index
    %13 = vector.load %arg2[%c0_15, %c0_16, %c0_17, %c1, %c0_18] : memref<1x1x18x18x4xf32, #tpu.memory_space<vmem>>, vector<1x1x16x16x4xf32>
    %14 = vector.shape_cast %13 : vector<1x1x16x16x4xf32> to vector<16x16x4xf32>
    %c0_19 = arith.constant 0 : index
    %c0_20 = arith.constant 0 : index
    %15 = vector.load %arg6[%c0_19, %c0_20] : memref<256x128xf32, #tpu.memory_space<vmem>>, vector<256x128xf32>
    %16 = vector.shape_cast %14 : vector<16x16x4xf32> to vector<256x4xf32>
    %c1_21 = arith.constant 1 : index
    %c0_22 = arith.constant 0 : index
    %c0_23 = arith.constant 0 : index
    %17 = vector.load %arg3[%c1_21, %c0_22, %c0_23] : memref<9x4x128xf32, #tpu.memory_space<vmem>>, vector<1x4x128xf32>
    %18 = vector.shape_cast %17 : vector<1x4x128xf32> to vector<4x128xf32>
    %cst_24 = arith.constant dense<0.000000e+00> : vector<256x128xf32>
    %19 = tpu.matmul %16, %18, %cst_24 {dimension_numbers = #tpu.dot_dimension_numbers<[1], [0], [0], [1], [0, 0, 1, 1], [], []>} : vector<256x4xf32>, vector<4x128xf32>, vector<256x128xf32> -> vector<256x128xf32>
    %20 = arith.addf %15, %19 : vector<256x128xf32>
    %c0_25 = arith.constant 0 : index
    %c0_26 = arith.constant 0 : index
    %21 = vector.load %arg6[%c0_25, %c0_26] : memref<256x128xf32, #tpu.memory_space<vmem>>, vector<256x128xf32>
    tpu.vector_store %arg6[%c0_25, %c0_26], %20 {strides = array<i32>} : memref<256x128xf32, #tpu.memory_space<vmem>>, vector<256x128xf32>,
    %c0_27 = arith.constant 0 : index
    %c0_28 = arith.constant 0 : index
    %c0_29 = arith.constant 0 : index
    %c2 = arith.constant 2 : index
    %c0_30 = arith.constant 0 : index
    %22 = vector.load %arg2[%c0_27, %c0_28, %c0_29, %c2, %c0_30] : memref<1x1x18x18x4xf32, #tpu.memory_space<vmem>>, vector<1x1x16x16x4xf32>
    %23 = vector.shape_cast %22 : vector<1x1x16x16x4xf32> to vector<16x16x4xf32>
    %c0_31 = arith.constant 0 : index
    %c0_32 = arith.constant 0 : index
    %24 = vector.load %arg6[%c0_31, %c0_32] : memref<256x128xf32, #tpu.memory_space<vmem>>, vector<256x128xf32>
    %25 = vector.shape_cast %23 : vector<16x16x4xf32> to vector<256x4xf32>
    %c2_33 = arith.constant 2 : index
    %c0_34 = arith.constant 0 : index
    %c0_35 = arith.constant 0 : index
    %26 = vector.load %arg3[%c2_33, %c0_34, %c0_35] : memref<9x4x128xf32, #tpu.memory_space<vmem>>, vector<1x4x128xf32>
    %27 = vector.shape_cast %26 : vector<1x4x128xf32> to vector<4x128xf32>
    %cst_36 = arith.constant dense<0.000000e+00> : vector<256x128xf32>
    %28 = tpu.matmul %25, %27, %cst_36 {dimension_numbers = #tpu.dot_dimension_numbers<[1], [0], [0], [1], [0, 0, 1, 1], [], []>} : vector<256x4xf32>, vector<4x128xf32>, vector<256x128xf32> -> vector<256x128xf32>
    %29 = arith.addf %24, %28 : vector<256x128xf32>
    %c0_37 = arith.constant 0 : index
    %c0_38 = arith.constant 0 : index
    %30 = vector.load %arg6[%c0_37, %c0_38] : memref<256x128xf32, #tpu.memory_space<vmem>>, vector<256x128xf32>
    tpu.vector_store %arg6[%c0_37, %c0_38], %29 {strides = array<i32>} : memref<256x128xf32, #tpu.memory_space<vmem>>, vector<256x128xf32>,
    %c0_39 = arith.constant 0 : index
    %c0_40 = arith.constant 0 : index
    %c1_41 = arith.constant 1 : index
    %c0_42 = arith.constant 0 : index
    %c0_43 = arith.constant 0 : index
    %31 = vector.load %arg2[%c0_39, %c0_40, %c1_41, %c0_42, %c0_43] : memref<1x1x18x18x4xf32, #tpu.memory_space<vmem>>, vector<1x1x16x16x4xf32>
    %32 = vector.shape_cast %31 : vector<1x1x16x16x4xf32> to vector<16x16x4xf32>
    %c0_44 = arith.constant 0 : index
    %c0_45 = arith.constant 0 : index
    %33 = vector.load %arg6[%c0_44, %c0_45] : memref<256x128xf32, #tpu.memory_space<vmem>>, vector<256x128xf32>
    %34 = vector.shape_cast %32 : vector<16x16x4xf32> to vector<256x4xf32>
    %c3 = arith.constant 3 : index
    %c0_46 = arith.constant 0 : index
    %c0_47 = arith.constant 0 : index
    %35 = vector.load %arg3[%c3, %c0_46, %c0_47] : memref<9x4x128xf32, #tpu.memory_space<vmem>>, vector<1x4x128xf32>
    %36 = vector.shape_cast %35 : vector<1x4x128xf32> to vector<4x128xf32>
    %cst_48 = arith.constant dense<0.000000e+00> : vector<256x128xf32>
    %37 = tpu.matmul %34, %36, %cst_48 {dimension_numbers = #tpu.dot_dimension_numbers<[1], [0], [0], [1], [0, 0, 1, 1], [], []>} : vector<256x4xf32>, vector<4x128xf32>, vector<256x128xf32> -> vector<256x128xf32>
    %38 = arith.addf %33, %37 : vector<256x128xf32>
    %c0_49 = arith.constant 0 : index
    %c0_50 = arith.constant 0 : index
    %39 = vector.load %arg6[%c0_49, %c0_50] : memref<256x128xf32, #tpu.memory_space<vmem>>, vector<256x128xf32>
    tpu.vector_store %arg6[%c0_49, %c0_50], %38 {strides = array<i32>} : memref<256x128xf32, #tpu.memory_space<vmem>>, vector<256x128xf32>,
    %c0_51 = arith.constant 0 : index
    %c0_52 = arith.constant 0 : index
    %c1_53 = arith.constant 1 : index
    %c1_54 = arith.constant 1 : index
    %c0_55 = arith.constant 0 : index
    %40 = vector.load %arg2[%c0_51, %c0_52, %c1_53, %c1_54, %c0_55] : memref<1x1x18x18x4xf32, #tpu.memory_space<vmem>>, vector<1x1x16x16x4xf32>
    %41 = vector.shape_cast %40 : vector<1x1x16x16x4xf32> to vector<16x16x4xf32>
    %c0_56 = arith.constant 0 : index
    %c0_57 = arith.constant 0 : index
    %42 = vector.load %arg6[%c0_56, %c0_57] : memref<256x128xf32, #tpu.memory_space<vmem>>, vector<256x128xf32>
    %43 = vector.shape_cast %41 : vector<16x16x4xf32> to vector<256x4xf32>
    %c4 = arith.constant 4 : index
    %c0_58 = arith.constant 0 : index
    %c0_59 = arith.constant 0 : index
    %44 = vector.load %arg3[%c4, %c0_58, %c0_59] : memref<9x4x128xf32, #tpu.memory_space<vmem>>, vector<1x4x128xf32>
    %45 = vector.shape_cast %44 : vector<1x4x128xf32> to vector<4x128xf32>
    %cst_60 = arith.constant dense<0.000000e+00> : vector<256x128xf32>
    %46 = tpu.matmul %43, %45, %cst_60 {dimension_numbers = #tpu.dot_dimension_numbers<[1], [0], [0], [1], [0, 0, 1, 1], [], []>} : vector<256x4xf32>, vector<4x128xf32>, vector<256x128xf32> -> vector<256x128xf32>
    %47 = arith.addf %42, %46 : vector<256x128xf32>
    %c0_61 = arith.constant 0 : index
    %c0_62 = arith.constant 0 : index
    %48 = vector.load %arg6[%c0_61, %c0_62] : memref<256x128xf32, #tpu.memory_space<vmem>>, vector<256x128xf32>
    tpu.vector_store %arg6[%c0_61, %c0_62], %47 {strides = array<i32>} : memref<256x128xf32, #tpu.memory_space<vmem>>, vector<256x128xf32>,
    %c0_63 = arith.constant 0 : index
    %c0_64 = arith.constant 0 : index
    %c1_65 = arith.constant 1 : index
    %c2_66 = arith.constant 2 : index
    %c0_67 = arith.constant 0 : index
    %49 = vector.load %arg2[%c0_63, %c0_64, %c1_65, %c2_66, %c0_67] : memref<1x1x18x18x4xf32, #tpu.memory_space<vmem>>, vector<1x1x16x16x4xf32>
    %50 = vector.shape_cast %49 : vector<1x1x16x16x4xf32> to vector<16x16x4xf32>
    %c0_68 = arith.constant 0 : index
    %c0_69 = arith.constant 0 : index
    %51 = vector.load %arg6[%c0_68, %c0_69] : memref<256x128xf32, #tpu.memory_space<vmem>>, vector<256x128xf32>
    %52 = vector.shape_cast %50 : vector<16x16x4xf32> to vector<256x4xf32>
    %c5 = arith.constant 5 : index
    %c0_70 = arith.constant 0 : index
    %c0_71 = arith.constant 0 : index
    %53 = vector.load %arg3[%c5, %c0_70, %c0_71] : memref<9x4x128xf32, #tpu.memory_space<vmem>>, vector<1x4x128xf32>
    %54 = vector.shape_cast %53 : vector<1x4x128xf32> to vector<4x128xf32>
    %cst_72 = arith.constant dense<0.000000e+00> : vector<256x128xf32>
    %55 = tpu.matmul %52, %54, %cst_72 {dimension_numbers = #tpu.dot_dimension_numbers<[1], [0], [0], [1], [0, 0, 1, 1], [], []>} : vector<256x4xf32>, vector<4x128xf32>, vector<256x128xf32> -> vector<256x128xf32>
    %56 = arith.addf %51, %55 : vector<256x128xf32>
    %c0_73 = arith.constant 0 : index
    %c0_74 = arith.constant 0 : index
    %57 = vector.load %arg6[%c0_73, %c0_74] : memref<256x128xf32, #tpu.memory_space<vmem>>, vector<256x128xf32>
    tpu.vector_store %arg6[%c0_73, %c0_74], %56 {strides = array<i32>} : memref<256x128xf32, #tpu.memory_space<vmem>>, vector<256x128xf32>,
    %c0_75 = arith.constant 0 : index
    %c0_76 = arith.constant 0 : index
    %c2_77 = arith.constant 2 : index
    %c0_78 = arith.constant 0 : index
    %c0_79 = arith.constant 0 : index
    %58 = vector.load %arg2[%c0_75, %c0_76, %c2_77, %c0_78, %c0_79] : memref<1x1x18x18x4xf32, #tpu.memory_space<vmem>>, vector<1x1x16x16x4xf32>
    %59 = vector.shape_cast %58 : vector<1x1x16x16x4xf32> to vector<16x16x4xf32>
    %c0_80 = arith.constant 0 : index
    %c0_81 = arith.constant 0 : index
    %60 = vector.load %arg6[%c0_80, %c0_81] : memref<256x128xf32, #tpu.memory_space<vmem>>, vector<256x128xf32>
    %61 = vector.shape_cast %59 : vector<16x16x4xf32> to vector<256x4xf32>
    %c6 = arith.constant 6 : index
    %c0_82 = arith.constant 0 : index
    %c0_83 = arith.constant 0 : index
    %62 = vector.load %arg3[%c6, %c0_82, %c0_83] : memref<9x4x128xf32, #tpu.memory_space<vmem>>, vector<1x4x128xf32>
    %63 = vector.shape_cast %62 : vector<1x4x128xf32> to vector<4x128xf32>
    %cst_84 = arith.constant dense<0.000000e+00> : vector<256x128xf32>
    %64 = tpu.matmul %61, %63, %cst_84 {dimension_numbers = #tpu.dot_dimension_numbers<[1], [0], [0], [1], [0, 0, 1, 1], [], []>} : vector<256x4xf32>, vector<4x128xf32>, vector<256x128xf32> -> vector<256x128xf32>
    %65 = arith.addf %60, %64 : vector<256x128xf32>
    %c0_85 = arith.constant 0 : index
    %c0_86 = arith.constant 0 : index
    %66 = vector.load %arg6[%c0_85, %c0_86] : memref<256x128xf32, #tpu.memory_space<vmem>>, vector<256x128xf32>
    tpu.vector_store %arg6[%c0_85, %c0_86], %65 {strides = array<i32>} : memref<256x128xf32, #tpu.memory_space<vmem>>, vector<256x128xf32>,
    %c0_87 = arith.constant 0 : index
    %c0_88 = arith.constant 0 : index
    %c2_89 = arith.constant 2 : index
    %c1_90 = arith.constant 1 : index
    %c0_91 = arith.constant 0 : index
    %67 = vector.load %arg2[%c0_87, %c0_88, %c2_89, %c1_90, %c0_91] : memref<1x1x18x18x4xf32, #tpu.memory_space<vmem>>, vector<1x1x16x16x4xf32>
    %68 = vector.shape_cast %67 : vector<1x1x16x16x4xf32> to vector<16x16x4xf32>
    %c0_92 = arith.constant 0 : index
    %c0_93 = arith.constant 0 : index
    %69 = vector.load %arg6[%c0_92, %c0_93] : memref<256x128xf32, #tpu.memory_space<vmem>>, vector<256x128xf32>
    %70 = vector.shape_cast %68 : vector<16x16x4xf32> to vector<256x4xf32>
    %c7 = arith.constant 7 : index
    %c0_94 = arith.constant 0 : index
    %c0_95 = arith.constant 0 : index
    %71 = vector.load %arg3[%c7, %c0_94, %c0_95] : memref<9x4x128xf32, #tpu.memory_space<vmem>>, vector<1x4x128xf32>
    %72 = vector.shape_cast %71 : vector<1x4x128xf32> to vector<4x128xf32>
    %cst_96 = arith.constant dense<0.000000e+00> : vector<256x128xf32>
    %73 = tpu.matmul %70, %72, %cst_96 {dimension_numbers = #tpu.dot_dimension_numbers<[1], [0], [0], [1], [0, 0, 1, 1], [], []>} : vector<256x4xf32>, vector<4x128xf32>, vector<256x128xf32> -> vector<256x128xf32>
    %74 = arith.addf %69, %73 : vector<256x128xf32>
    %c0_97 = arith.constant 0 : index
    %c0_98 = arith.constant 0 : index
    %75 = vector.load %arg6[%c0_97, %c0_98] : memref<256x128xf32, #tpu.memory_space<vmem>>, vector<256x128xf32>
    tpu.vector_store %arg6[%c0_97, %c0_98], %74 {strides = array<i32>} : memref<256x128xf32, #tpu.memory_space<vmem>>, vector<256x128xf32>,
    %c0_99 = arith.constant 0 : index
    %c0_100 = arith.constant 0 : index
    %c2_101 = arith.constant 2 : index
    %c2_102 = arith.constant 2 : index
    %c0_103 = arith.constant 0 : index
    %76 = vector.load %arg2[%c0_99, %c0_100, %c2_101, %c2_102, %c0_103] : memref<1x1x18x18x4xf32, #tpu.memory_space<vmem>>, vector<1x1x16x16x4xf32>
    %77 = vector.shape_cast %76 : vector<1x1x16x16x4xf32> to vector<16x16x4xf32>
    %c0_104 = arith.constant 0 : index
    %c0_105 = arith.constant 0 : index
    %78 = vector.load %arg6[%c0_104, %c0_105] : memref<256x128xf32, #tpu.memory_space<vmem>>, vector<256x128xf32>
    %79 = vector.shape_cast %77 : vector<16x16x4xf32> to vector<256x4xf32>
    %c8 = arith.constant 8 : index
    %c0_106 = arith.constant 0 : index
    %c0_107 = arith.constant 0 : index
    %80 = vector.load %arg3[%c8, %c0_106, %c0_107] : memref<9x4x128xf32, #tpu.memory_space<vmem>>, vector<1x4x128xf32>
    %81 = vector.shape_cast %80 : vector<1x4x128xf32> to vector<4x128xf32>
    %cst_108 = arith.constant dense<0.000000e+00> : vector<256x128xf32>
    %82 = tpu.matmul %79, %81, %cst_108 {dimension_numbers = #tpu.dot_dimension_numbers<[1], [0], [0], [1], [0, 0, 1, 1], [], []>} : vector<256x4xf32>, vector<4x128xf32>, vector<256x128xf32> -> vector<256x128xf32>
    %83 = arith.addf %78, %82 : vector<256x128xf32>
    %c0_109 = arith.constant 0 : index
    %c0_110 = arith.constant 0 : index
    %84 = vector.load %arg6[%c0_109, %c0_110] : memref<256x128xf32, #tpu.memory_space<vmem>>, vector<256x128xf32>
    tpu.vector_store %arg6[%c0_109, %c0_110], %83 {strides = array<i32>} : memref<256x128xf32, #tpu.memory_space<vmem>>, vector<256x128xf32>,
    %c0_111 = arith.constant 0 : index
    %c0_112 = arith.constant 0 : index
    %85 = vector.load %arg6[%c0_111, %c0_112] : memref<256x128xf32, #tpu.memory_space<vmem>>, vector<256x128xf32>
    %86 = vector.shape_cast %85 : vector<256x128xf32> to vector<1x1x256x128xf32>
    %c0_113 = arith.constant 0 : index
    %c0_114 = arith.constant 0 : index
    %c0_115 = arith.constant 0 : index
    %c0_116 = arith.constant 0 : index
    %87 = vector.load %arg5[%c0_113, %c0_114, %c0_115, %c0_116] : memref<1x1x256x128xf32, #tpu.memory_space<vmem>>, vector<1x1x256x128xf32>
    tpu.vector_store %arg5[%c0_113, %c0_114, %c0_115, %c0_116], %86 {strides = array<i32>} : memref<1x1x256x128xf32, #tpu.memory_space<vmem>>, vector<1x1x256x128xf32>,
    return
  }
  func.func @transform_0(%arg0: i32, %arg1: i32) -> (i32, i32, i32, i32, i32) {
    %c0_i32 = arith.constant 0 : i32
    %c0_i32_0 = arith.constant 0 : i32
    %c0_i32_1 = arith.constant 0 : i32
    %c0_i32_2 = arith.constant 0 : i32
    return %arg0, %arg1, %c0_i32, %c0_i32_0, %c0_i32_1 : i32, i32, i32, i32, i32
  }
  func.func @transform_1(%arg0: i32, %arg1: i32) -> (i32, i32, i32) {
    %c0_i32 = arith.constant 0 : i32
    %c0_i32_0 = arith.constant 0 : i32
    %c0_i32_1 = arith.constant 0 : i32
    %c0_i32_2 = arith.constant 0 : i32
    return %c0_i32, %c0_i32_0, %c0_i32_1 : i32, i32, i32
  }
  func.func @transform_2(%arg0: i32, %arg1: i32) -> (i32, i32) {
    %c0_i32 = arith.constant 0 : i32
    %c0_i32_0 = arith.constant 0 : i32
    %c0_i32_1 = arith.constant 0 : i32
    return %c0_i32, %c0_i32_0 : i32, i32
  }
  func.func @transform_3(%arg0: i32, %arg1: i32) -> (i32, i32, i32, i32) {
    %c0_i32 = arith.constant 0 : i32
    %c0_i32_0 = arith.constant 0 : i32
    %c0_i32_1 = arith.constant 0 : i32
    return %arg0, %arg1, %c0_i32, %c0_i32_0 : i32, i32, i32, i32
  }
}

</mosaic_0001>

<bundles_post_ra>
// kernel: tpu_custom_call.1
= control target key start
LH: loop header
LB: loop body
LE: loop exit
PB: predicated region body
PF: predicated region fallthrough
CT: control target
= control target key end

     0   :  { %8 = vsyncpa [#allocation4], 0  ;;  %s7326_s0 = inlined_call_operand.vmem [shape: f32[2,1,18,18,4], index: 0, kind: input, shape index: {}]   ;;  %s7327_s1 = inlined_call_operand.vmem [shape: f32[9,4,128], index: 1, kind: input, shape index: {}]   ;;  %s7328_s2 = inlined_call_operand.vmem [shape: f32[1,128], index: 2, kind: input, shape index: {}]   ;;  %s7329_s3 = inlined_call_operand.hbm [shape: f32[2,1,256,128], index: 3, kind: output, shape index: {}]  }
   0x1   :  { %10 = vsyncpa [#allocation4 + $0x1], 0  ;;  %s6196_s12 = smov 0   ;;  %s6198_s13 = smov 0  }
   0x2   :  { %s6200_s14 = smov 0   ;;  %s6202_s15 = smov 0  }
   0x3   :  { %s6204_s16 = smov 0   ;;  %s6206_s17 = smov 0  }
   0x4 LB: > { %s4487_s18 = sadd.s32 4294967295, %s6171_s17   ;;  %s4488_s19 = sadd.s32 4294967294, %s6171_s17   ;;  %s6171_s17 = sphi %s6206_s17, %s16_s17   ;;  %s6167_s16 = sphi %s6204_s16, %s7456_s16   ;;  %s6163_s15 = sphi %s6202_s15, %s7455_s15   ;;  %s6159_s14 = sphi %s6200_s14, %s7454_s14   ;;  %s6155_s13 = sphi %s6198_s13, %s7453_s13   ;;  %s6151_s12 = sphi %s6196_s12, %s7452_s12  }
   0x5   : > { %s28_s20 = sadd.s32 1, %s6167_s16  ;;  %s107_s21 = sadd.s32 1, %s6159_s14 }
   0x6   : > { %p30_p0 = scmp.ge.s32.totalorder %s28_s20, 2  ;;  %p117_p1 = scmp.ne.s32.totalorder %s6159_s14, %s6155_s13 }
   0x7   : > { %p118_p2 = scmp.eq.s32.totalorder %s4487_s18, 1  ;;  %p123_p3 = scmp.ne.s32.totalorder %s6155_s13, %s6151_s12 }
   0x8   : > { %s7458_s20 = smov (%p30_p0, %s28_s20), 0  ;;  %p124_p5 = scmp.eq.s32.totalorder %s4488_s19, 1 }
   0x9   : > { %p6236_p4 = por %p118_p2, %p117_p1  ;;  %s102_s23 = ssub.s32 %s6167_s16, %s7458_s20 }
   0xa   : > { %p4491_p6 = scmp.ge.s32.totalorder %s6171_s17, 1  ;;  %p105_p7 = scmp.eq.s32.totalorder %s102_s23, 0 }
   0xb   : > { %p6243_p8 = por %p124_p5, %p123_p3  ;;  %p160_p9 = scmp.lt.s32.totalorder %s6171_s17, 3 }
   0xc   : > { %s6249_s25 = scalar_select %p105_p7, %s6159_s14, %s107_s21  }
   0xd   : > { %p161_p10 = pnand %p4491_p6, %p160_p9 }
   0xf   : > { %164 = sbr.rel (%p161_p10) target bundleno = 547 (0x223), region = 32 }
  0x16   : > { %v300_v0 = vld [vmem:[%s7327_s1] sm:$0xf]  ;;  %vm398_vm0 = vcmask 1043456   ;;  %v6257_v1 = vld [vmem:[%s7327_s1 + $0x10] sm:$0xf]  ;;  %p188_p11 = scmp.lt.s32.totalorder %s6163_s15, 1 }
  0x17   : > { %5295 = vmatprep.subr.msk.mxu1 %vm398_vm0, %v300_v0  ;;  %5495 = vmatprep.subr.msk.mxu0 %vm398_vm0, %v6257_v1  ;;  %v4528_v2 = vld [vmem:[%s7327_s1 + $0x4] sm:$0xf]  ;;  %v4760_v3 = vld [vmem:[%s7327_s1 + $0x14] sm:$0xf]  ;;  %vm301_vm1 = vcmask 31744   ;;  %s185_s5 = sand.u32 1, %s6155_s13  }
  0x18   : > { %5296 = vmatpush3.msk.msra.mxu1 %vm398_vm0, %v300_v0  ;;  %s189_s7 = scalar_select %p188_p11, %s6163_s15, 1  ;;  %5496 = vmatpush3.msk.msra.mxu0 %vm398_vm0, %v6257_v1  ;;  %v6303_v10 = vld [vmem:[%s7327_s1 + $0x18] sm:$0xf]  ;;  %v6308_v11 = vld [vmem:[%s7327_s1 + $0x8] sm:$0xf] }
  0x19   : > { %5345 = vmatprep.subr.msk.mxu1 %vm398_vm0, %v4528_v2  ;;  %5545 = vmatprep.subr.msk.mxu0 %vm398_vm0, %v4760_v3  ;;  %v6475_v44 = vld [vmem:[%s7327_s1 + $0x1c] sm:$0xf]  ;;  %s4997_s10 = sshll.u32 %s6163_s15, 12  ;;  %s7280_s15 = scalar_lea.sflag [#allocation4], %s185_s5 }
  0x1a   : > { %s6035_s8 = smul.u32 432, %s189_s7  ;;  %s7272_s21 = scalar_lea.hbm %s7329_s3, %s4997_s10 }
  0x1b   : > { %s6173_s26 = smov [#allocation3]  }
  0x1c   : > { %s6278_s11 = scalar_lea.vmem %s7326_s0, %s6035_s8  ;;  %s4492_s8 = sshll.u32 %s185_s5, 8 }
  0x1d   : > { %v236_v4 = vld [vmem:[%s6278_s11] sm:$0xff]  ;;  %v237_v6 = vld [vmem:[%s6278_s11 + $0x8] sm:$0xff]  ;;  %v6292_v8 = vld [vmem:[%s6278_s11 + $0x18] sm:$0xff]  ;;  %s7206_s9 = scalar_lea.vmem [#allocation3], %s4492_s8  ;;  %s6097_s27 = sshll.u32 %s6173_s26, 4  ;;  %s6098_s27 = int_to_ptr.vmem [resolvable:$false] %s6097_s27 }
  0x1e   : > { %v6282_v5 = vld [vmem:[%s6278_s11 + $0x19] sm:$0xff]  ;;  %5297 = vmatprep.mubr.msk.f32.mxu1 %vm301_vm1, %v236_v4  ;;  %v6289_v7 = vld [vmem:[%s6278_s11 + $0x21] sm:$0xff]  ;;  %7382 = vst [vmem:[#allocation6_spill] sm:$0xff] %v6292_v8  ;;  %v6295_v9 = vld [vmem:[%s6278_s11 + $0x31] sm:$0xff]  ;;  %s6099_s28 = scalar_lea.vmem %s6098_s27, 8192 }
  0x1f   : > { %5497 = vmatprep.mubr.msk.f32.mxu0 %vm301_vm1, %v6282_v5  ;;  %5298 = vmatmul.mubr.msk.f32.vlgmr.msra.gmra.mrb[0].mxu1 %vm301_vm1, %v237_v6  ;;  %v6313_v12 = vld [vmem:[%s6278_s11 + $0x20] sm:$0xff]  ;;  %v6323_v14 = vld [vmem:[%s6278_s11 + $0x30] sm:$0xff]  ;;  %v6341_v16 = vld [vmem:[%s6278_s11 + $0x38] sm:$0xff] }
  0x20   : > { %5498 = vmatmul.mubr.msk.f32.vlgmr.msra.gmra.mrb[0].mxu0 %vm301_vm1, %v6289_v7  ;;  %5346 = vmatpush3.msk.msra.mxu1 %vm398_vm0, %v4528_v2  ;;  %7383 = vst [vmem:[#allocation7_spill] sm:$0xff] %v6313_v12  ;;  %v6316_v13 = vld [vmem:[%s6278_s11 + $0x39] sm:$0xff]  ;;  %7384 = vst [vmem:[#allocation8_spill] sm:$0xff] %v6323_v14  ;;  %v6326_v15 = vld [vmem:[%s6278_s11 + $0x49] sm:$0xff] }
  0x21   : > { %5546 = vmatpush3.msk.msra.mxu0 %vm398_vm0, %v4760_v3  ;;  %5300 = vmatprep.mubr.msk.f32.mxu1 %vm301_vm1, %v6292_v8  ;;  %v6344_v17 = vld [vmem:[%s6278_s11 + $0x51] sm:$0xff]  ;;  %v6347_v18 = vld [vmem:[%s6278_s11 + $0x48] sm:$0xff]  ;;  %v6367_v22 = vld [vmem:[%s6278_s11 + $0x60] sm:$0xff] }
  0x22   : > { %5500 = vmatprep.mubr.msk.f32.mxu0 %vm301_vm1, %v6295_v9  ;;  %5595 = vmatprep.subr.msk.mxu0 %vm398_vm0, %v6303_v10  ;;  %7385 = vst [vmem:[#allocation9_spill] sm:$0xff] %v6347_v18  ;;  %v6350_v19 = vld [vmem:[%s6278_s11 + $0x61] sm:$0xff]  ;;  %v6361_v20 = vld [vmem:[%s6278_s11 + $0x50] sm:$0xff]  ;;  %7387 = vst [vmem:[#allocation11_spill] sm:$0xff] %v6367_v22 }
  0x23   : > { %5395 = vmatprep.subr.msk.mxu1 %vm398_vm0, %v6308_v11  ;;  %5301 = vmatmul.mubr.msk.f32.gmra.mrb[2].mxu1 %vm301_vm1, %v6313_v12  ;;  %7386 = vst [vmem:[#allocation10_spill] sm:$0xff] %v6361_v20  ;;  %v6364_v21 = vld [vmem:[%s6278_s11 + $0x69] sm:$0xff]  ;;  %v6370_v23 = vld [vmem:[%s6278_s11 + $0x79] sm:$0xff]  ;;  %v6384_v25 = vld [vmem:[%s6278_s11 + $0x81] sm:$0xff] }
  0x24   : > { %5501 = vmatmul.mubr.msk.f32.gmra.mrb[2].mxu0 %vm301_vm1, %v6316_v13  ;;  %5303 = vmatprep.mubr.msk.f32.mxu1 %vm301_vm1, %v6323_v14  ;;  %v6381_v24 = vld [vmem:[%s6278_s11 + $0x68] sm:$0xff]  ;;  %v6387_v26 = vld [vmem:[%s6278_s11 + $0x78] sm:$0xff]  ;;  %v6401_v28 = vld [vmem:[%s6278_s11 + $0x80] sm:$0xff] }
  0x25   : > { %5503 = vmatprep.mubr.msk.f32.mxu0 %vm301_vm1, %v6326_v15  ;;  %7388 = vst [vmem:[#allocation12_spill] sm:$0xff] %v6381_v24  ;;  %7389 = vst [vmem:[#allocation13_spill] sm:$0xff] %v6387_v26  ;;  %v6390_v27 = vld [vmem:[%s6278_s11 + $0x91] sm:$0xff]  ;;  %v6404_v29 = vld [vmem:[%s6278_s11 + $0x99] sm:$0xff] }
  0x26   : > { %7390 = vst [vmem:[#allocation14_spill] sm:$0xff] %v6401_v28  ;;  %v6407_v30 = vld [vmem:[%s6278_s11 + $0x90] sm:$0xff]  ;;  %v6421_v32 = vld [vmem:[%s6278_s11 + $0x98] sm:$0xff]  ;;  %v6427_v34 = vld [vmem:[%s6278_s11 + $0xa8] sm:$0xff] }
  0x27   : > { %5304 = vmatmul.mubr.msk.f32.gmra.mrb[4].mxu1 %vm301_vm1, %v6341_v16  ;;  %7391 = vst [vmem:[#allocation15_spill] sm:$0xff] %v6407_v30  ;;  %v6410_v31 = vld [vmem:[%s6278_s11 + $0xa9] sm:$0xff]  ;;  %7392 = vst [vmem:[#allocation16_spill] sm:$0xff] %v6421_v32  ;;  %v6424_v33 = vld [vmem:[%s6278_s11 + $0xb1] sm:$0xff] }
  0x28   : > { %5504 = vmatmul.mubr.msk.f32.gmra.mrb[4].mxu0 %vm301_vm1, %v6344_v17  ;;  %5306 = vmatprep.mubr.msk.f32.mxu1 %vm301_vm1, %v6347_v18  ;;  %7393 = vst [vmem:[#allocation17_spill] sm:$0xff] %v6427_v34  ;;  %v6430_v35 = vld [vmem:[%s6278_s11 + $0xc1] sm:$0xff]  ;;  %v6441_v36 = vld [vmem:[%s6278_s11 + $0xb0] sm:$0xff]  ;;  %v6467_v42 = vld [vmem:[%s6278_s11 + $0xd8] sm:$0xff] }
  0x29   : > { %5506 = vmatprep.mubr.msk.f32.mxu0 %vm301_vm1, %v6350_v19  ;;  %7394 = vst [vmem:[#allocation18_spill] sm:$0xff] %v6441_v36  ;;  %v6444_v37 = vld [vmem:[%s6278_s11 + $0xc9] sm:$0xff]  ;;  %v6447_v38 = vld [vmem:[%s6278_s11 + $0xc0] sm:$0xff]  ;;  %v6470_v43 = vld [vmem:[%s6278_s11 + $0x32] sm:$0xff] }
  0x2a   : > { %v6450_v39 = vld [vmem:[%s6278_s11 + $0x1a] sm:$0xff]  ;;  %v6461_v40 = vld [vmem:[%s6278_s11 + $0xc8] sm:$0xff]  ;;  %v6494_v47 = vld [vmem:[%s6278_s11 + $0xf0] sm:$0xff] }
  0x2b   : > { %5307 = vmatmul.mubr.msk.f32.gmra.mrb[6].mxu1 %vm301_vm1, %v6361_v20  ;;  %7395 = vst [vmem:[#allocation19_spill] sm:$0xff] %v6461_v40  ;;  %v6464_v41 = vld [vmem:[%s6278_s11 + $0x22] sm:$0xff]  ;;  %v6489_v46 = vld [vmem:[%s6278_s11 + $0x3a] sm:$0xff]  ;;  %v6497_v48 = vld [vmem:[%s6278_s11 + $0x4a] sm:$0xff] }
  0x2c   : > { %5507 = vmatmul.mubr.msk.f32.gmra.mrb[6].mxu0 %vm301_vm1, %v6364_v21  ;;  %5309 = vmatprep.mubr.msk.f32.mxu1 %vm301_vm1, %v6367_v22  ;;  %v6486_v45 = vld [vmem:[%s6278_s11 + $0xe0] sm:$0xff]  ;;  %v6510_v49 = vld [vmem:[%s6278_s11 + $0xf8] sm:$0xff]  ;;  %v6516_v51 = vld [vmem:[%s6278_s11 + $0x108] sm:$0xff] }
  0x2d   : > { %5509 = vmatprep.mubr.msk.f32.mxu0 %vm301_vm1, %v6370_v23  ;;  %v6513_v50 = vld [vmem:[%s6278_s11 + $0x52] sm:$0xff]  ;;  %v6519_v52 = vld [vmem:[%s6278_s11 + $0x62] sm:$0xff]  ;;  %v6533_v54 = vld [vmem:[%s6278_s11 + $0x6a] sm:$0xff] }
  0x2e   : > { %v6530_v53 = vld [vmem:[%s6278_s11 + $0x110] sm:$0xff]  ;;  %v6536_v55 = vld [vmem:[%s6278_s11 + $0x120] sm:$0xff]  ;;  %v6550_v57 = vld [vmem:[%s6278_s11 + $0x128] sm:$0xff] }
  0x2f   : > { %5310 = vmatmul.mubr.msk.f32.gmra.mrb[8].mxu1 %vm301_vm1, %v6381_v24  ;;  %v6539_v56 = vld [vmem:[%s6278_s11 + $0x7a] sm:$0xff]  ;;  %v6553_v58 = vld [vmem:[%s6278_s11 + $0x82] sm:$0xff]  ;;  %v6559_v60 = vld [vmem:[%s6278_s11 + $0x92] sm:$0xff] }
  0x30   : > { %5510 = vmatmul.mubr.msk.f32.gmra.mrb[8].mxu0 %vm301_vm1, %v6384_v25  ;;  %5312 = vmatprep.mubr.msk.f32.mxu1 %vm301_vm1, %v6387_v26  ;;  %v6556_v59 = vld [vmem:[%s6278_s11 + $0x138] sm:$0xff]  ;;  %7396 = vst [vmem:[#allocation20_spill] sm:$0xff] %v6559_v60  ;;  %v6570_v61 = vld [vmem:[%s6278_s11 + $0x140] sm:$0xff]  ;;  %v6576_v63 = vld [vmem:[%s6278_s11 + $0x150] sm:$0xff] }
  0x31   : > { %5512 = vmatprep.mubr.msk.f32.mxu0 %vm301_vm1, %v6390_v27  ;;  %v6573_v62 = vld [vmem:[%s6278_s11 + $0x9a] sm:$0xff]  ;;  %v6579_v0 = vld [vmem:[%s6278_s11 + $0xaa] sm:$0xff]  ;;  %v6593_v3 = vld [vmem:[%s6278_s11 + $0xb2] sm:$0xff] }
  0x32   : > { %7397 = vst [vmem:[#allocation21_spill] sm:$0xff] %v6573_v62  ;;  %7398 = vst [vmem:[#allocation22_spill] sm:$0xff] %v6579_v0  ;;  %v6590_v2 = vld [vmem:[%s6278_s11 + $0x158] sm:$0xff]  ;;  %v6596_v4 = vld [vmem:[%s6278_s11 + $0x168] sm:$0xff] }
  0x33   : > { %5313 = vmatmul.mubr.msk.f32.gmra.mrb[10].mxu1 %vm301_vm1, %v6401_v28  ;;  %7399 = vst [vmem:[#allocation23_spill] sm:$0xff] %v6590_v2  ;;  %7400 = vst [vmem:[#allocation24_spill] sm:$0xff] %v6593_v3  ;;  %v6599_v6 = vld [vmem:[%s6278_s11 + $0xc2] sm:$0xff]  ;;  %v6613_v12 = vld [vmem:[%s6278_s11 + $0xca] sm:$0xff] }
  0x34   : > { %5513 = vmatmul.mubr.msk.f32.gmra.mrb[10].mxu0 %vm301_vm1, %v6404_v29  ;;  %5315 = vmatprep.mubr.msk.f32.mxu1 %vm301_vm1, %v6407_v30  ;;  %7401 = vst [vmem:[#allocation25_spill] sm:$0xff] %v6596_v4  ;;  %7402 = vst [vmem:[#allocation26_spill] sm:$0xff] %v6599_v6  ;;  %v691_v8 = vld [vmem:[%s6278_s11 + $0x1] sm:$0xff] }
  0x35   : > { %5515 = vmatprep.mubr.msk.f32.mxu0 %vm301_vm1, %v6410_v31 }
  0x37   : > { %5316 = vmatmul.mubr.msk.f32.gmra.mrb[12].mxu1 %vm301_vm1, %v6421_v32 }
  0x38   : > { %5516 = vmatmul.mubr.msk.f32.gmra.mrb[12].mxu0 %vm301_vm1, %v6424_v33  ;;  %5318 = vmatprep.mubr.msk.f32.mxu1 %vm301_vm1, %v6427_v34 }
  0x39   : > { %5518 = vmatprep.mubr.msk.f32.mxu0 %vm301_vm1, %v6430_v35 }
  0x3b   : > { %5319 = vmatmul.mubr.msk.f32.gmra.mrb[14].mxu1 %vm301_vm1, %v6441_v36 }
  0x3c   : > { %5519 = vmatmul.mubr.msk.f32.gmra.mrb[14].mxu0 %vm301_vm1, %v6444_v37  ;;  %5321 = vmatprep.mubr.msk.f32.mxu1 %vm301_vm1, %v6447_v38 }
  0x3d   : > { %5547 = vmatprep.mubr.msk.f32.mxu0 %vm301_vm1, %v6450_v39 }
  0x3f   : > { %5322 = vmatmul.mubr.msk.f32.gmra.mrb[16].mxu1 %vm301_vm1, %v6461_v40 }
  0x40   : > { %5548 = vmatmul.mubr.msk.f32.vlgmr.msra.gmra.mrb[0].mxu0 %vm301_vm1, %v6464_v41  ;;  %5324 = vmatprep.mubr.msk.f32.mxu1 %vm301_vm1, %v6467_v42 }
  0x41   : > { %5596 = vmatpush3.msk.msra.mxu0 %vm398_vm0, %v6303_v10  ;;  %5550 = vmatprep.mubr.msk.f32.mxu0 %vm301_vm1, %v6470_v43  ;;  %v6610_v10 = vld [vmem:[%s6278_s11 + $0x170] sm:$0xff] }
  0x42   : > { %5645 = vmatprep.subr.msk.mxu0 %vm398_vm0, %v6475_v44  ;;  %7403 = vst [vmem:[#allocation27_spill] sm:$0xff] %v6610_v10 }
  0x43   : > { %5325 = vmatmul.mubr.msk.f32.gmra.mrb[18].mxu1 %vm301_vm1, %v6486_v45 }
  0x44   : > { %5551 = vmatmul.mubr.msk.f32.gmra.mrb[2].mxu0 %vm301_vm1, %v6489_v46  ;;  %5327 = vmatprep.mubr.msk.f32.mxu1 %vm301_vm1, %v6494_v47 }
  0x45   : > { %5553 = vmatprep.mubr.msk.f32.mxu0 %vm301_vm1, %v6497_v48 }
  0x47   : > { %5328 = vmatmul.mubr.msk.f32.gmra.mrb[20].mxu1 %vm301_vm1, %v6510_v49 }
  0x48   : > { %5554 = vmatmul.mubr.msk.f32.gmra.mrb[4].mxu0 %vm301_vm1, %v6513_v50  ;;  %5330 = vmatprep.mubr.msk.f32.mxu1 %vm301_vm1, %v6516_v51 }
  0x49   : > { %5556 = vmatprep.mubr.msk.f32.mxu0 %vm301_vm1, %v6519_v52 }
  0x4b   : > { %5331 = vmatmul.mubr.msk.f32.gmra.mrb[22].mxu1 %vm301_vm1, %v6530_v53 }
  0x4c   : > { %5557 = vmatmul.mubr.msk.f32.gmra.mrb[6].mxu0 %vm301_vm1, %v6533_v54  ;;  %5333 = vmatprep.mubr.msk.f32.mxu1 %vm301_vm1, %v6536_v55 }
  0x4d   : > { %5559 = vmatprep.mubr.msk.f32.mxu0 %vm301_vm1, %v6539_v56 }
  0x4f   : > { %5334 = vmatmul.mubr.msk.f32.gmra.mrb[24].mxu1 %vm301_vm1, %v6550_v57 }
  0x50   : > { %5560 = vmatmul.mubr.msk.f32.gmra.mrb[8].mxu0 %vm301_vm1, %v6553_v58  ;;  %5336 = vmatprep.mubr.msk.f32.mxu1 %vm301_vm1, %v6556_v59 }
  0x51   : > { %5562 = vmatprep.mubr.msk.f32.mxu0 %vm301_vm1, %v6559_v60  ;;  %v6636_v60 = vld [vmem:[%s7327_s1 + $0xc] sm:$0xf] }
  0x53   : > { %5337 = vmatmul.mubr.msk.f32.gmra.mrb[26].mxu1 %vm301_vm1, %v6570_v61 }
  0x54   : > { %5563 = vmatmul.mubr.msk.f32.gmra.mrb[10].mxu0 %vm301_vm1, %v6573_v62  ;;  %5339 = vmatprep.mubr.msk.f32.mxu1 %vm301_vm1, %v6576_v63  ;;  %v6631_v62 = vld [vmem:[%s6278_s11 + $0xf2] sm:$0xff] }
  0x55   : > { %5565 = vmatprep.mubr.msk.f32.mxu0 %vm301_vm1, %v6579_v0  ;;  %v6617_v0 = vld [vmem:[%s6278_s11 + $0xda] sm:$0xff] }
  0x56   : > { %7404 = vst [vmem:[#allocation28_spill] sm:$0xff] %v6617_v0 }
  0x57   : > { %5340 = vmatmul.mubr.msk.f32.gmra.mrb[28].mxu1 %vm301_vm1, %v6590_v2 }
  0x58   : > { %5566 = vmatmul.mubr.msk.f32.gmra.mrb[12].mxu0 %vm301_vm1, %v6593_v3  ;;  %5342 = vmatprep.mubr.msk.f32.mxu1 %vm301_vm1, %v6596_v4  ;;  %v6628_v3 = vld [vmem:[%s6278_s11 + $0xe2] sm:$0xff] }
  0x59   : > { %5568 = vmatprep.mubr.msk.f32.mxu0 %vm301_vm1, %v6599_v6  ;;  %v692_v6 = vld [vmem:[%s6278_s11 + $0x9] sm:$0xff] }
  0x5b   : > { %5343 = vmatmul.mubr.msk.f32.gmra.mrb[30].mxu1 %vm301_vm1, %v6610_v10 }
  0x5c   : > { %5569 = vmatmul.mubr.msk.f32.gmra.mrb[14].mxu0 %vm301_vm1, %v6613_v12  ;;  %5347 = vmatprep.mubr.msk.f32.mxu1 %vm301_vm1, %v691_v8  ;;  %v6646_v8 = vld [vmem:[%s6278_s11 + $0xfa] sm:$0xff] }
  0x5d   : > { %5571 = vmatprep.mubr.msk.f32.mxu0 %vm301_vm1, %v6617_v0  ;;  %v6651_v0 = vld [vmem:[%s6278_s11 + $0x10a] sm:$0xff] }
  0x5f   : > { %5348 = vmatmul.mubr.msk.f32.vlgmr.msra.gmra.mrb[0].mxu1 %vm301_vm1, %v692_v6  ;;  %v6681_v6 = vld [vmem:[%s6278_s11 + $0x13a] sm:$0xff] }
  0x60   : > { %5572 = vmatmul.mubr.msk.f32.gmra.mrb[16].mxu0 %vm301_vm1, %v6628_v3  ;;  %5396 = vmatpush3.msk.msra.mxu1 %vm398_vm0, %v6308_v11  ;;  %v6667_v11 = vld [vmem:[%s6278_s11 + $0x122] sm:$0xff]  ;;  %7408 = vst [vmem:[#allocation32_spill] sm:$0xff] %v6681_v6 }
  0x61   : > { %5350 = vmatprep.mubr.msk.f32.mxu1 %vm301_vm1, %v6282_v5  ;;  %5574 = vmatprep.mubr.msk.f32.mxu0 %vm301_vm1, %v6631_v62  ;;  %v6664_v5 = vld [vmem:[%s6278_s11 + $0x112] sm:$0xff]  ;;  %7406 = vst [vmem:[#allocation30_spill] sm:$0xff] %v6667_v11 }
  0x62   : > { %5445 = vmatprep.subr.msk.mxu1 %vm398_vm0, %v6636_v60  ;;  %7405 = vst [vmem:[#allocation29_spill] sm:$0xff] %v6664_v5 }
  0x63   : > { %5351 = vmatmul.mubr.msk.f32.gmra.mrb[2].mxu1 %vm301_vm1, %v6289_v7  ;;  %v6678_v7 = vld [vmem:[%s6278_s11 + $0x12a] sm:$0xff] }
  0x64   : > { %5575 = vmatmul.mubr.msk.f32.gmra.mrb[18].mxu0 %vm301_vm1, %v6646_v8  ;;  %5353 = vmatprep.mubr.msk.f32.mxu1 %vm301_vm1, %v6295_v9  ;;  %7407 = vst [vmem:[#allocation31_spill] sm:$0xff] %v6678_v7 }
  0x65   : > { %5577 = vmatprep.mubr.msk.f32.mxu0 %vm301_vm1, %v6651_v0 }
  0x67   : > { %5354 = vmatmul.mubr.msk.f32.gmra.mrb[4].mxu1 %vm301_vm1, %v6316_v13 }
  0x68   : > { %5578 = vmatmul.mubr.msk.f32.gmra.mrb[20].mxu0 %vm301_vm1, %v6664_v5  ;;  %5356 = vmatprep.mubr.msk.f32.mxu1 %vm301_vm1, %v6326_v15  ;;  %v6692_v5 = vld [vmem:[%s6278_s11 + $0x142] sm:$0xff] }
  0x69   : > { %5580 = vmatprep.mubr.msk.f32.mxu0 %vm301_vm1, %v6667_v11  ;;  %7409 = vst [vmem:[#allocation33_spill] sm:$0xff] %v6692_v5  ;;  %v6695_v11 = vld [vmem:[%s6278_s11 + $0x152] sm:$0xff] }
  0x6a   : > { %7410 = vst [vmem:[#allocation34_spill] sm:$0xff] %v6695_v11 }
  0x6b   : > { %5357 = vmatmul.mubr.msk.f32.gmra.mrb[6].mxu1 %vm301_vm1, %v6344_v17 }
  0x6c   : > { %5581 = vmatmul.mubr.msk.f32.gmra.mrb[22].mxu0 %vm301_vm1, %v6678_v7  ;;  %5359 = vmatprep.mubr.msk.f32.mxu1 %vm301_vm1, %v6350_v19  ;;  %v6706_v7 = vld [vmem:[%s6278_s11 + $0x15a] sm:$0xff] }
  0x6d   : > { %5583 = vmatprep.mubr.msk.f32.mxu0 %vm301_vm1, %v6681_v6  ;;  %7411 = vst [vmem:[#allocation35_spill] sm:$0xff] %v6706_v7  ;;  %v6709_v6 = vld [vmem:[%s6278_s11 + $0x16a] sm:$0xff] }
  0x6f   : > { %5360 = vmatmul.mubr.msk.f32.gmra.mrb[8].mxu1 %vm301_vm1, %v6364_v21 }
  0x70   : > { %5584 = vmatmul.mubr.msk.f32.gmra.mrb[24].mxu0 %vm301_vm1, %v6692_v5  ;;  %5362 = vmatprep.mubr.msk.f32.mxu1 %vm301_vm1, %v6370_v23  ;;  %v6720_v5 = vld [vmem:[%s6278_s11 + $0x172] sm:$0xff] }
  0x71   : > { %5586 = vmatprep.mubr.msk.f32.mxu0 %vm301_vm1, %v6695_v11  ;;  %7412 = vst [vmem:[#allocation36_spill] sm:$0xff] %v6720_v5  ;;  %v6723_v11 = vld [vmem:[%s6278_s11 + $0x182] sm:$0xff] }
  0x72   : > { %7413 = vst [vmem:[#allocation37_spill] sm:$0xff] %v6723_v11 }
  0x73   : > { %5363 = vmatmul.mubr.msk.f32.gmra.mrb[10].mxu1 %vm301_vm1, %v6384_v25 }
  0x74   : > { %5587 = vmatmul.mubr.msk.f32.gmra.mrb[26].mxu0 %vm301_vm1, %v6706_v7  ;;  %5365 = vmatprep.mubr.msk.f32.mxu1 %vm301_vm1, %v6390_v27  ;;  %v6734_v7 = vld [vmem:[%s6278_s11 + $0x18a] sm:$0xff] }
  0x75   : > { %5589 = vmatprep.mubr.msk.f32.mxu0 %vm301_vm1, %v6709_v6  ;;  %7414 = vst [vmem:[#allocation38_spill] sm:$0xff] %v6734_v7 }
  0x77   : > { %5366 = vmatmul.mubr.msk.f32.gmra.mrb[12].mxu1 %vm301_vm1, %v6404_v29 }
  0x78   : > { %5590 = vmatmul.mubr.msk.f32.gmra.mrb[28].mxu0 %vm301_vm1, %v6720_v5  ;;  %5368 = vmatprep.mubr.msk.f32.mxu1 %vm301_vm1, %v6410_v31  ;;  %v6745_v5 = vld [vmem:[%s6278_s11 + $0xd9] sm:$0xff] }
  0x79   : > { %5592 = vmatprep.mubr.msk.f32.mxu0 %vm301_vm1, %v6723_v11  ;;  %v6750_v11 = vld [vmem:[%s7327_s1 + $0x20] sm:$0xf] }
  0x7b   : > { %5369 = vmatmul.mubr.msk.f32.gmra.mrb[14].mxu1 %vm301_vm1, %v6424_v33 }
  0x7c   : > { %5593 = vmatmul.mubr.msk.f32.gmra.mrb[30].mxu0 %vm301_vm1, %v6734_v7  ;;  %5371 = vmatprep.mubr.msk.f32.mxu1 %vm301_vm1, %v6430_v35  ;;  %v6761_v7 = vld [vmem:[%s6278_s11 + $0xe1] sm:$0xff] }
  0x7d   : > { %5597 = vmatprep.mubr.msk.f32.mxu0 %vm301_vm1, %v6323_v14  ;;  %v6766_v14 = vld [vmem:[%s6278_s11 + $0xf1] sm:$0xff] }
  0x7f   : > { %5372 = vmatmul.mubr.msk.f32.gmra.mrb[16].mxu1 %vm301_vm1, %v6444_v37 }
  0x80   : > { %5598 = vmatmul.mubr.msk.f32.vlgmr.msra.gmra.mrb[0].mxu0 %vm301_vm1, %v6341_v16  ;;  %5374 = vmatprep.mubr.msk.f32.mxu1 %vm301_vm1, %v6745_v5 }
  0x81   : > { %5646 = vmatpush3.msk.msra.mxu0 %vm398_vm0, %v6475_v44  ;;  %5600 = vmatprep.mubr.msk.f32.mxu0 %vm301_vm1, %v6347_v18  ;;  %v6779_v44 = vld [vmem:[%s6278_s11 + $0xf9] sm:$0xff]  ;;  %v6782_v18 = vld [vmem:[%s6278_s11 + $0x109] sm:$0xff] }
  0x82   : > { %5695 = vmatprep.subr.msk.mxu0 %vm398_vm0, %v6750_v11 }
  0x83   : > { %5375 = vmatmul.mubr.msk.f32.gmra.mrb[18].mxu1 %vm301_vm1, %v6761_v7 }
  0x84   : > { %5601 = vmatmul.mubr.msk.f32.gmra.mrb[2].mxu0 %vm301_vm1, %v6361_v20  ;;  %5377 = vmatprep.mubr.msk.f32.mxu1 %vm301_vm1, %v6766_v14  ;;  %v6793_v20 = vld [vmem:[%s6278_s11 + $0x111] sm:$0xff] }
  0x85   : > { %5603 = vmatprep.mubr.msk.f32.mxu0 %vm301_vm1, %v6367_v22  ;;  %v6796_v22 = vld [vmem:[%s6278_s11 + $0x121] sm:$0xff] }
  0x87   : > { %5378 = vmatmul.mubr.msk.f32.gmra.mrb[20].mxu1 %vm301_vm1, %v6779_v44 }
  0x88   : > { %5604 = vmatmul.mubr.msk.f32.gmra.mrb[4].mxu0 %vm301_vm1, %v6381_v24  ;;  %5380 = vmatprep.mubr.msk.f32.mxu1 %vm301_vm1, %v6782_v18  ;;  %v6807_v24 = vld [vmem:[%s6278_s11 + $0x129] sm:$0xff] }
  0x89   : > { %5606 = vmatprep.mubr.msk.f32.mxu0 %vm301_vm1, %v6387_v26  ;;  %v6810_v26 = vld [vmem:[%s6278_s11 + $0x139] sm:$0xff] }
  0x8b   : > { %5381 = vmatmul.mubr.msk.f32.gmra.mrb[22].mxu1 %vm301_vm1, %v6793_v20 }
  0x8c   : > { %5607 = vmatmul.mubr.msk.f32.gmra.mrb[6].mxu0 %vm301_vm1, %v6401_v28  ;;  %5383 = vmatprep.mubr.msk.f32.mxu1 %vm301_vm1, %v6796_v22  ;;  %v6821_v28 = vld [vmem:[%s6278_s11 + $0x141] sm:$0xff] }
  0x8d   : > { %5609 = vmatprep.mubr.msk.f32.mxu0 %vm301_vm1, %v6407_v30  ;;  %v6824_v30 = vld [vmem:[%s6278_s11 + $0x151] sm:$0xff] }
  0x8e   : > { %7415 = vst [vmem:[#allocation39_spill] sm:$0xff] %v6824_v30 }
  0x8f   : > { %5384 = vmatmul.mubr.msk.f32.gmra.mrb[24].mxu1 %vm301_vm1, %v6807_v24 }
  0x90   : > { %5610 = vmatmul.mubr.msk.f32.gmra.mrb[8].mxu0 %vm301_vm1, %v6421_v32  ;;  %5386 = vmatprep.mubr.msk.f32.mxu1 %vm301_vm1, %v6810_v26  ;;  %v6835_v32 = vld [vmem:[%s6278_s11 + $0x159] sm:$0xff] }
  0x91   : > { %5612 = vmatprep.mubr.msk.f32.mxu0 %vm301_vm1, %v6427_v34  ;;  %v6838_v34 = vld [vmem:[%s6278_s11 + $0x169] sm:$0xff] }
  0x93   : > { %5387 = vmatmul.mubr.msk.f32.gmra.mrb[26].mxu1 %vm301_vm1, %v6821_v28 }
  0x94   : > { %5613 = vmatmul.mubr.msk.f32.gmra.mrb[10].mxu0 %vm301_vm1, %v6441_v36  ;;  %5389 = vmatprep.mubr.msk.f32.mxu1 %vm301_vm1, %v6824_v30  ;;  %v6849_v36 = vld [vmem:[%s6278_s11 + $0x171] sm:$0xff]  ;;  %v1145_v30 = vld [vmem:[%s6278_s11 + $0x2] sm:$0xff] }
  0x95   : > { %5615 = vmatprep.mubr.msk.f32.mxu0 %vm301_vm1, %v6447_v38 }
  0x97   : > { %5390 = vmatmul.mubr.msk.f32.gmra.mrb[28].mxu1 %vm301_vm1, %v6835_v32 }
  0x98   : > { %5616 = vmatmul.mubr.msk.f32.gmra.mrb[12].mxu0 %vm301_vm1, %v6461_v40  ;;  %5392 = vmatprep.mubr.msk.f32.mxu1 %vm301_vm1, %v6838_v34  ;;  %v1146_v40 = vld [vmem:[%s6278_s11 + $0xa] sm:$0xff] }
  0x99   : > { %5618 = vmatprep.mubr.msk.f32.mxu0 %vm301_vm1, %v6467_v42 }
  0x9b   : > { %5393 = vmatmul.mubr.msk.f32.gmra.mrb[30].mxu1 %vm301_vm1, %v6849_v36 }
  0x9c   : > { %5619 = vmatmul.mubr.msk.f32.gmra.mrb[14].mxu0 %vm301_vm1, %v6486_v45  ;;  %5397 = vmatprep.mubr.msk.f32.mxu1 %vm301_vm1, %v1145_v30  ;;  %v6904_v30 = vld [vmem:[%s6278_s11 + $0x180] sm:$0xff] }
  0x9d   : > { %5621 = vmatprep.mubr.msk.f32.mxu0 %vm301_vm1, %v6494_v47  ;;  %7416 = vst [vmem:[#allocation40_spill] sm:$0xff] %v6904_v30 }
  0x9f   : > { %5398 = vmatmul.mubr.msk.f32.vlgmr.msra.gmra.mrb[0].mxu1 %vm301_vm1, %v1146_v40  ;;  %v6915_v40 = vld [vmem:[%s6278_s11 + $0x188] sm:$0xff] }
  0xa0   : > { %5622 = vmatmul.mubr.msk.f32.gmra.mrb[16].mxu0 %vm301_vm1, %v6510_v49  ;;  %5446 = vmatpush3.msk.msra.mxu1 %vm398_vm0, %v6636_v60  ;;  %v7418_v60 = vld [vmem:[#allocation21_spill] sm:$0xff] }
  0xa1   : > { %5400 = vmatprep.mubr.msk.f32.mxu1 %vm301_vm1, %v6450_v39  ;;  %5624 = vmatprep.mubr.msk.f32.mxu0 %vm301_vm1, %v6516_v51  ;;  %v7417_v39 = vld [vmem:[#allocation20_spill] sm:$0xff] }
  0xa2   : > { %5745 = vmatprep.subr.msk.mxu1 %vm398_vm0, %v6257_v1 }
  0xa3   : > { %5401 = vmatmul.mubr.msk.f32.gmra.mrb[2].mxu1 %vm301_vm1, %v6464_v41  ;;  %v4824_v41 = vld [vmem:[%s6278_s11 + $0x198] sm:$0xff] }
  0xa4   : > { %5625 = vmatmul.mubr.msk.f32.gmra.mrb[18].mxu0 %vm301_vm1, %v6530_v53  ;;  %5403 = vmatprep.mubr.msk.f32.mxu1 %vm301_vm1, %v6470_v43 }
  0xa5   : > { %5627 = vmatprep.mubr.msk.f32.mxu0 %vm301_vm1, %v6536_v55 }
  0xa7   : > { %5404 = vmatmul.mubr.msk.f32.gmra.mrb[4].mxu1 %vm301_vm1, %v6489_v46 }
  0xa8   : > { %5628 = vmatmul.mubr.msk.f32.gmra.mrb[20].mxu0 %vm301_vm1, %v6550_v57  ;;  %5406 = vmatprep.mubr.msk.f32.mxu1 %vm301_vm1, %v6497_v48 }
  0xa9   : > { %5630 = vmatprep.mubr.msk.f32.mxu0 %vm301_vm1, %v6556_v59 }
  0xab   : > { %5407 = vmatmul.mubr.msk.f32.gmra.mrb[6].mxu1 %vm301_vm1, %v6513_v50 }
  0xac   : > { %5631 = vmatmul.mubr.msk.f32.gmra.mrb[22].mxu0 %vm301_vm1, %v6570_v61  ;;  %5409 = vmatprep.mubr.msk.f32.mxu1 %vm301_vm1, %v6519_v52 }
  0xad   : > { %5633 = vmatprep.mubr.msk.f32.mxu0 %vm301_vm1, %v6576_v63 }
  0xaf   : > { %5410 = vmatmul.mubr.msk.f32.gmra.mrb[8].mxu1 %vm301_vm1, %v6533_v54 }
  0xb0   : > { %5634 = vmatmul.mubr.msk.f32.gmra.mrb[24].mxu0 %vm301_vm1, %v6590_v2  ;;  %5412 = vmatprep.mubr.msk.f32.mxu1 %vm301_vm1, %v6539_v56  ;;  %v7420_v2 = vld [vmem:[#allocation24_spill] sm:$0xff] }
  0xb1   : > { %5636 = vmatprep.mubr.msk.f32.mxu0 %vm301_vm1, %v6596_v4  ;;  %v7419_v4 = vld [vmem:[#allocation22_spill] sm:$0xff] }
  0xb3   : > { %5413 = vmatmul.mubr.msk.f32.gmra.mrb[10].mxu1 %vm301_vm1, %v6553_v58 }
  0xb4   : > { %5637 = vmatmul.mubr.msk.f32.gmra.mrb[26].mxu0 %vm301_vm1, %v6610_v10  ;;  %5415 = vmatprep.mubr.msk.f32.mxu1 %vm301_vm1, %v7417_v39  ;;  %v4825_v10 = vld [vmem:[%s6278_s11 + $0x1a0] sm:$0xff] }
  0xb5   : > { %5639 = vmatprep.mubr.msk.f32.mxu0 %vm301_vm1, %v6904_v30  ;;  %v7421_v30 = vld [vmem:[#allocation26_spill] sm:$0xff] }
  0xb7   : > { %5416 = vmatmul.mubr.msk.f32.gmra.mrb[12].mxu1 %vm301_vm1, %v7418_v60 }
  0xb8   : > { %5640 = vmatmul.mubr.msk.f32.gmra.mrb[28].mxu0 %vm301_vm1, %v6915_v40  ;;  %5418 = vmatprep.mubr.msk.f32.mxu1 %vm301_vm1, %v7419_v4 }
  0xb9   : > { %5642 = vmatprep.mubr.msk.f32.mxu0 %vm301_vm1, %v4824_v41  ;;  %v7422_v41 = vld [vmem:[#allocation28_spill] sm:$0xff] }
  0xbb   : > { %5419 = vmatmul.mubr.msk.f32.gmra.mrb[14].mxu1 %vm301_vm1, %v7420_v2 }
  0xbc   : > { %5643 = vmatmul.mubr.msk.f32.gmra.mrb[30].mxu0 %vm301_vm1, %v4825_v10  ;;  %5421 = vmatprep.mubr.msk.f32.mxu1 %vm301_vm1, %v7421_v30  ;;  %v7439_v10 = vld [vmem:[#allocation39_spill] sm:$0xff] }
  0xbd   : > { %5647 = vmatprep.mubr.msk.f32.mxu0 %vm301_vm1, %v6295_v9  ;;  %v7423_v9 = vld [vmem:[#allocation29_spill] sm:$0xff] }
  0xbf   : > { %5422 = vmatmul.mubr.msk.f32.gmra.mrb[16].mxu1 %vm301_vm1, %v6613_v12 }
  0xc0   : > { %5648 = vmatmul.mubr.msk.f32.vlgmr.msra.gmra.mrb[0].mxu0 %vm301_vm1, %v6316_v13  ;;  %5424 = vmatprep.mubr.msk.f32.mxu1 %vm301_vm1, %v7422_v41  ;;  %v7424_v13 = vld [vmem:[#allocation30_spill] sm:$0xff] }
  0xc1   : > { %5696 = vmatpush3.msk.msra.mxu0 %vm398_vm0, %v6750_v11  ;;  %5650 = vmatprep.mubr.msk.f32.mxu0 %vm301_vm1, %v6326_v15  ;;  %v7425_v15 = vld [vmem:[#allocation31_spill] sm:$0xff]  ;;  %v7440_v11 = vld [vmem:[#allocation14_spill] sm:$0xff] }
  0xc3   : > { %5425 = vmatmul.mubr.msk.f32.gmra.mrb[18].mxu1 %vm301_vm1, %v6628_v3 }
  0xc4   : > { %5651 = vmatmul.mubr.msk.f32.gmra.mrb[2].mxu0 %vm301_vm1, %v6344_v17  ;;  %5427 = vmatprep.mubr.msk.f32.mxu1 %vm301_vm1, %v6631_v62  ;;  %v7426_v17 = vld [vmem:[#allocation32_spill] sm:$0xff] }
  0xc5   : > { %5653 = vmatprep.mubr.msk.f32.mxu0 %vm301_vm1, %v6350_v19  ;;  %v7427_v19 = vld [vmem:[#allocation33_spill] sm:$0xff] }
  0xc7   : > { %5428 = vmatmul.mubr.msk.f32.gmra.mrb[20].mxu1 %vm301_vm1, %v6646_v8 }
  0xc8   : > { %5654 = vmatmul.mubr.msk.f32.gmra.mrb[4].mxu0 %vm301_vm1, %v6364_v21  ;;  %5430 = vmatprep.mubr.msk.f32.mxu1 %vm301_vm1, %v6651_v0  ;;  %v7428_v21 = vld [vmem:[#allocation34_spill] sm:$0xff] }
  0xc9   : > { %5656 = vmatprep.mubr.msk.f32.mxu0 %vm301_vm1, %v6370_v23  ;;  %v7429_v23 = vld [vmem:[#allocation35_spill] sm:$0xff] }
  0xcb   : > { %5431 = vmatmul.mubr.msk.f32.gmra.mrb[22].mxu1 %vm301_vm1, %v7423_v9 }
  0xcc   : > { %5657 = vmatmul.mubr.msk.f32.gmra.mrb[6].mxu0 %vm301_vm1, %v6384_v25  ;;  %5433 = vmatprep.mubr.msk.f32.mxu1 %vm301_vm1, %v7424_v13  ;;  %v7430_v25 = vld [vmem:[#allocation36_spill] sm:$0xff] }
  0xcd   : > { %5659 = vmatprep.mubr.msk.f32.mxu0 %vm301_vm1, %v6390_v27  ;;  %v7431_v27 = vld [vmem:[#allocation6_spill] sm:$0xff] }
  0xcf   : > { %5434 = vmatmul.mubr.msk.f32.gmra.mrb[24].mxu1 %vm301_vm1, %v7425_v15 }
  0xd0   : > { %5660 = vmatmul.mubr.msk.f32.gmra.mrb[8].mxu0 %vm301_vm1, %v6404_v29  ;;  %5436 = vmatprep.mubr.msk.f32.mxu1 %vm301_vm1, %v7426_v17  ;;  %v7432_v29 = vld [vmem:[#allocation7_spill] sm:$0xff] }
  0xd1   : > { %5662 = vmatprep.mubr.msk.f32.mxu0 %vm301_vm1, %v6410_v31  ;;  %v7433_v31 = vld [vmem:[#allocation8_spill] sm:$0xff] }
  0xd3   : > { %5437 = vmatmul.mubr.msk.f32.gmra.mrb[26].mxu1 %vm301_vm1, %v7427_v19 }
  0xd4   : > { %5663 = vmatmul.mubr.msk.f32.gmra.mrb[10].mxu0 %vm301_vm1, %v6424_v33  ;;  %5439 = vmatprep.mubr.msk.f32.mxu1 %vm301_vm1, %v7428_v21  ;;  %v7434_v33 = vld [vmem:[#allocation9_spill] sm:$0xff] }
  0xd5   : > { %5665 = vmatprep.mubr.msk.f32.mxu0 %vm301_vm1, %v6430_v35  ;;  %v7436_v35 = vld [vmem:[#allocation11_spill] sm:$0xff] }
  0xd7   : > { %5440 = vmatmul.mubr.msk.f32.gmra.mrb[28].mxu1 %vm301_vm1, %v7429_v23 }
  0xd8   : > { %5666 = vmatmul.mubr.msk.f32.gmra.mrb[12].mxu0 %vm301_vm1, %v6444_v37  ;;  %5442 = vmatprep.mubr.msk.f32.mxu1 %vm301_vm1, %v6709_v6  ;;  %v7438_v37 = vld [vmem:[#allocation13_spill] sm:$0xff] }
  0xd9   : > { %5668 = vmatprep.mubr.msk.f32.mxu0 %vm301_vm1, %v6745_v5 }
  0xdb   : > { %5443 = vmatmul.mubr.msk.f32.gmra.mrb[30].mxu1 %vm301_vm1, %v7430_v25 }
  0xdc   : > { %5669 = vmatmul.mubr.msk.f32.gmra.mrb[14].mxu0 %vm301_vm1, %v6761_v7  ;;  %5447 = vmatprep.mubr.msk.f32.mxu1 %vm301_vm1, %v7431_v27  ;;  %v7441_v27 = vld [vmem:[#allocation15_spill] sm:$0xff] }
  0xdd   : > { %5671 = vmatprep.mubr.msk.f32.mxu0 %vm301_vm1, %v6766_v14 }
  0xdf   : > { %5448 = vmatmul.mubr.msk.f32.vlgmr.msra.gmra.mrb[0].mxu1 %vm301_vm1, %v7432_v29  ;;  %v7042_v29 = vld [vmem:[%s6278_s11 + $0x181] sm:$0xff] }
  0xe0   : > { %5672 = vmatmul.mubr.msk.f32.gmra.mrb[16].mxu0 %vm301_vm1, %v6779_v44  ;;  %5746 = vmatpush3.msk.msra.mxu1 %vm398_vm0, %v6257_v1  ;;  %v7435_v1 = vld [vmem:[#allocation10_spill] sm:$0xff] }
  0xe1   : > { %5450 = vmatprep.mubr.msk.f32.mxu1 %vm301_vm1, %v7433_v31  ;;  %5674 = vmatprep.mubr.msk.f32.mxu0 %vm301_vm1, %v6782_v18  ;;  %v7442_v31 = vld [vmem:[#allocation16_spill] sm:$0xff] }
  0xe3   : > { %5451 = vmatmul.mubr.msk.f32.gmra.mrb[2].mxu1 %vm301_vm1, %v6341_v16  ;;  %v7437_v16 = vld [vmem:[#allocation12_spill] sm:$0xff] }
  0xe4   : > { %5675 = vmatmul.mubr.msk.f32.gmra.mrb[18].mxu0 %vm301_vm1, %v6793_v20  ;;  %5453 = vmatprep.mubr.msk.f32.mxu1 %vm301_vm1, %v7434_v33  ;;  %v7443_v33 = vld [vmem:[#allocation17_spill] sm:$0xff] }
  0xe5   : > { %5677 = vmatprep.mubr.msk.f32.mxu0 %vm301_vm1, %v6796_v22 }
  0xe7   : > { %5454 = vmatmul.mubr.msk.f32.gmra.mrb[4].mxu1 %vm301_vm1, %v7435_v1  ;;  %v7053_v1 = vld [vmem:[%s6278_s11 + $0x189] sm:$0xff] }
  0xe8   : > { %5678 = vmatmul.mubr.msk.f32.gmra.mrb[20].mxu0 %vm301_vm1, %v6807_v24  ;;  %5456 = vmatprep.mubr.msk.f32.mxu1 %vm301_vm1, %v7436_v35  ;;  %v4890_v35 = vld [vmem:[%s6278_s11 + $0x199] sm:$0xff] }
  0xe9   : > { %5680 = vmatprep.mubr.msk.f32.mxu0 %vm301_vm1, %v6810_v26 }
  0xeb   : > { %5457 = vmatmul.mubr.msk.f32.gmra.mrb[6].mxu1 %vm301_vm1, %v7437_v16  ;;  %v7444_v16 = vld [vmem:[#allocation18_spill] sm:$0xff] }
  0xec   : > { %5681 = vmatmul.mubr.msk.f32.gmra.mrb[22].mxu0 %vm301_vm1, %v6821_v28  ;;  %5459 = vmatprep.mubr.msk.f32.mxu1 %vm301_vm1, %v7438_v37  ;;  %v4891_v37 = vld [vmem:[%s6278_s11 + $0x1a1] sm:$0xff] }
  0xed   : > { %5683 = vmatprep.mubr.msk.f32.mxu0 %vm301_vm1, %v7439_v10 }
  0xef   : > { %5460 = vmatmul.mubr.msk.f32.gmra.mrb[8].mxu1 %vm301_vm1, %v7440_v11  ;;  %v7445_v11 = vld [vmem:[#allocation19_spill] sm:$0xff] }
  0xf0   : > { %5684 = vmatmul.mubr.msk.f32.gmra.mrb[24].mxu0 %vm301_vm1, %v6835_v32  ;;  %5462 = vmatprep.mubr.msk.f32.mxu1 %vm301_vm1, %v7441_v27 }
  0xf1   : > { %5686 = vmatprep.mubr.msk.f32.mxu0 %vm301_vm1, %v6838_v34 }
  0xf3   : > { %5463 = vmatmul.mubr.msk.f32.gmra.mrb[10].mxu1 %vm301_vm1, %v7442_v31 }
  0xf4   : > { %5687 = vmatmul.mubr.msk.f32.gmra.mrb[26].mxu0 %vm301_vm1, %v6849_v36  ;;  %5465 = vmatprep.mubr.msk.f32.mxu1 %vm301_vm1, %v7443_v33 }
  0xf5   : > { %5689 = vmatprep.mubr.msk.f32.mxu0 %vm301_vm1, %v7042_v29 }
  0xf7   : > { %5466 = vmatmul.mubr.msk.f32.gmra.mrb[12].mxu1 %vm301_vm1, %v7444_v16 }
  0xf8   : > { %5690 = vmatmul.mubr.msk.f32.gmra.mrb[28].mxu0 %vm301_vm1, %v7053_v1  ;;  %5468 = vmatprep.mubr.msk.f32.mxu1 %vm301_vm1, %v6447_v38  ;;  %v7446_v38 = vld [vmem:[#allocation23_spill] sm:$0xff] }
  0xf9   : > { %5692 = vmatprep.mubr.msk.f32.mxu0 %vm301_vm1, %v4890_v35 }
  0xfb   : > { %5469 = vmatmul.mubr.msk.f32.gmra.mrb[14].mxu1 %vm301_vm1, %v7445_v11 }
  0xfc   : > { %5693 = vmatmul.mubr.msk.f32.gmra.mrb[30].mxu0 %vm301_vm1, %v4891_v37  ;;  %5471 = vmatprep.mubr.msk.f32.mxu1 %vm301_vm1, %v6467_v42  ;;  %v7447_v42 = vld [vmem:[#allocation25_spill] sm:$0xff] }
  0xfd   : > { %5697 = vmatprep.mubr.msk.f32.mxu0 %vm301_vm1, %v6470_v43  ;;  %v7448_v43 = vld [vmem:[#allocation27_spill] sm:$0xff] }
  0xff   : > { %5472 = vmatmul.mubr.msk.f32.gmra.mrb[16].mxu1 %vm301_vm1, %v6486_v45  ;;  %v7449_v45 = vld [vmem:[#allocation40_spill] sm:$0xff] }
 0x100   : > { %5698 = vmatmul.mubr.msk.f32.vlgmr.msra.gmra.mrb[0].mxu0 %vm301_vm1, %v6489_v46  ;;  %5474 = vmatprep.mubr.msk.f32.mxu1 %vm301_vm1, %v6494_v47 }
 0x101   : > { %5700 = vmatprep.mubr.msk.f32.mxu0 %vm301_vm1, %v6497_v48 }
 0x103   : > { %5475 = vmatmul.mubr.msk.f32.gmra.mrb[18].mxu1 %vm301_vm1, %v6510_v49 }
 0x104   : > { %5701 = vmatmul.mubr.msk.f32.gmra.mrb[2].mxu0 %vm301_vm1, %v6513_v50  ;;  %5477 = vmatprep.mubr.msk.f32.mxu1 %vm301_vm1, %v6516_v51 }
 0x105   : > { %5703 = vmatprep.mubr.msk.f32.mxu0 %vm301_vm1, %v6519_v52 }
 0x107   : > { %5478 = vmatmul.mubr.msk.f32.gmra.mrb[20].mxu1 %vm301_vm1, %v6530_v53  ;;  %v7199_v53 = vld [vmem:[%s7328_s2] ss:$0 sm:$0xff] }
 0x108   : > { %5704 = vmatmul.mubr.msk.f32.gmra.mrb[4].mxu0 %vm301_vm1, %v6533_v54  ;;  %5480 = vmatprep.mubr.msk.f32.mxu1 %vm301_vm1, %v6536_v55 }
 0x109   : > { %5706 = vmatprep.mubr.msk.f32.mxu0 %vm301_vm1, %v6539_v56 }
 0x10b   : > { %5481 = vmatmul.mubr.msk.f32.gmra.mrb[22].mxu1 %vm301_vm1, %v6550_v57 }
 0x10c   : > { %5707 = vmatmul.mubr.msk.f32.gmra.mrb[6].mxu0 %vm301_vm1, %v6553_v58  ;;  %5483 = vmatprep.mubr.msk.f32.mxu1 %vm301_vm1, %v6556_v59 }
 0x10d   : > { %5709 = vmatprep.mubr.msk.f32.mxu0 %vm301_vm1, %v7417_v39 }
 0x10f   : > { %5484 = vmatmul.mubr.msk.f32.gmra.mrb[24].mxu1 %vm301_vm1, %v6570_v61 }
 0x110   : > { %5710 = vmatmul.mubr.msk.f32.gmra.mrb[8].mxu0 %vm301_vm1, %v7418_v60  ;;  %5486 = vmatprep.mubr.msk.f32.mxu1 %vm301_vm1, %v6576_v63 }
 0x111   : > { %5712 = vmatprep.mubr.msk.f32.mxu0 %vm301_vm1, %v7419_v4 }
 0x113   : > { %5487 = vmatmul.mubr.msk.f32.gmra.mrb[26].mxu1 %vm301_vm1, %v7446_v38 }
 0x114   : > { %5713 = vmatmul.mubr.msk.f32.gmra.mrb[10].mxu0 %vm301_vm1, %v7420_v2  ;;  %5489 = vmatprep.mubr.msk.f32.mxu1 %vm301_vm1, %v7447_v42 }
 0x115   : > { %5715 = vmatprep.mubr.msk.f32.mxu0 %vm301_vm1, %v7421_v30 }
 0x117   : > { %5490 = vmatmul.mubr.msk.f32.gmra.mrb[28].mxu1 %vm301_vm1, %v7448_v43 }
 0x118   : > { %5716 = vmatmul.mubr.msk.f32.gmra.mrb[12].mxu0 %vm301_vm1, %v6613_v12  ;;  %5492 = vmatprep.mubr.msk.f32.mxu1 %vm301_vm1, %v7449_v45  ;;  %v7450_v12 = vld [vmem:[#allocation37_spill] sm:$0xff] }
 0x119   : > { %5718 = vmatprep.mubr.msk.f32.mxu0 %vm301_vm1, %v7422_v41 }
 0x11b   : > { %5493 = vmatmul.mubr.msk.f32.gmra.mrb[30].mxu1 %vm301_vm1, %v6915_v40 }
 0x11c   : > { %5719 = vmatmul.mubr.msk.f32.gmra.mrb[14].mxu0 %vm301_vm1, %v6628_v3  ;;  %5521 = vmatprep.mubr.msk.f32.mxu1 %vm301_vm1, %v6745_v5 }
 0x11d   : > { %5721 = vmatprep.mubr.msk.f32.mxu0 %vm301_vm1, %v6631_v62 }
 0x11f   : > { %5522 = vmatmul.mubr.msk.f32.vlgmr.msra.gmra.mrb[16].mxu1 %vm301_vm1, %v6761_v7 }
 0x120   : > { %5722 = vmatmul.mubr.msk.f32.gmra.mrb[16].mxu0 %vm301_vm1, %v6646_v8  ;;  %5524 = vmatprep.mubr.msk.f32.mxu1 %vm301_vm1, %v6766_v14  ;;  %v4956_v14 = vld [vmem:[%s6278_s11 + $0x19a] sm:$0xff] }
 0x121   : > { %5724 = vmatprep.mubr.msk.f32.mxu0 %vm301_vm1, %v6651_v0 }
 0x123   : > { %5525 = vmatmul.mubr.msk.f32.gmra.mrb[18].mxu1 %vm301_vm1, %v6779_v44 }
 0x124   : > { %5725 = vmatmul.mubr.msk.f32.gmra.mrb[18].mxu0 %vm301_vm1, %v7423_v9  ;;  %5527 = vmatprep.mubr.msk.f32.mxu1 %vm301_vm1, %v6782_v18  ;;  %v7451_v18 = vld [vmem:[#allocation38_spill] sm:$0xff] }
 0x125   : > { %5727 = vmatprep.mubr.msk.f32.mxu0 %vm301_vm1, %v7424_v13 }
 0x127   : > { %5528 = vmatmul.mubr.msk.f32.gmra.mrb[20].mxu1 %vm301_vm1, %v6793_v20  ;;  %v4957_v20 = vld [vmem:[%s6278_s11 + $0x1a2] sm:$0xff]  ;;  %s4405_s11 = sshll.u32 %s7206_s9, 4  ;;  %s7274_s11 = int_to_ptr.vmem [resolvable:$true] %s4405_s11 }
 0x128   : > { %5728 = vmatmul.mubr.msk.f32.gmra.mrb[20].mxu0 %vm301_vm1, %v7425_v15  ;;  %5530 = vmatprep.mubr.msk.f32.mxu1 %vm301_vm1, %v6796_v22  ;;  %s6093_s23 = scalar_lea.vmem %s7274_s11, 4096  ;;  %p6100_p1 = scmp.lt.s32.totalorder %s7274_s11, %s6098_s27 }
 0x129   : > { %5730 = vmatprep.mubr.msk.f32.mxu0 %vm301_vm1, %v7426_v17  ;;  %p6094_p12 = scmp.ne.s32.totalorder %s7274_s11, %s6093_s23  ;;  %p6101_p2 = scmp.lt.s32.totalorder %s6099_s28, %s6093_s23 }
 0x12b   : > { %5531 = vmatmul.mubr.msk.f32.gmra.mrb[22].mxu1 %vm301_vm1, %v6807_v24  ;;  %p6095_p13 = pnand %p6094_p12, %p6236_p4  ;;  %p6102_p3 = por %p6101_p2, %p6100_p1 }
 0x12c   : > { %5731 = vmatmul.mubr.msk.f32.gmra.mrb[22].mxu0 %vm301_vm1, %v7427_v19  ;;  %5533 = vmatprep.mubr.msk.f32.mxu1 %vm301_vm1, %v6810_v26 }
 0x12d   : > { %5733 = vmatprep.mubr.msk.f32.mxu0 %vm301_vm1, %v7428_v21  ;;  %p6096_p0 = pneg %p6095_p13 }
 0x12f   : > { %5534 = vmatmul.mubr.msk.f32.gmra.mrb[24].mxu1 %vm301_vm1, %v6821_v28  ;;  %p6103_p5 = pnand %p6102_p3, %p6096_p0 }
 0x130   : > { %5734 = vmatmul.mubr.msk.f32.gmra.mrb[24].mxu0 %vm301_vm1, %v7429_v23  ;;  %5536 = vmatprep.mubr.msk.f32.mxu1 %vm301_vm1, %v7439_v10 }
 0x131   : > { %5736 = vmatprep.mubr.msk.f32.mxu0 %vm301_vm1, %v6709_v6 }
 0x133   : > { %5537 = vmatmul.mubr.msk.f32.gmra.mrb[26].mxu1 %vm301_vm1, %v6835_v32 }
 0x134   : > { %5737 = vmatmul.mubr.msk.f32.gmra.mrb[26].mxu0 %vm301_vm1, %v7430_v25  ;;  %5539 = vmatprep.mubr.msk.f32.mxu1 %vm301_vm1, %v6838_v34 }
 0x135   : > { %5739 = vmatprep.mubr.msk.f32.mxu0 %vm301_vm1, %v7450_v12 }
 0x137   : > { %5540 = vmatmul.mubr.msk.f32.gmra.mrb[28].mxu1 %vm301_vm1, %v6849_v36 }
 0x138   : > { %5740 = vmatmul.mubr.msk.f32.gmra.mrb[28].mxu0 %vm301_vm1, %v7451_v18  ;;  %5542 = vmatprep.mubr.msk.f32.mxu1 %vm301_vm1, %v7042_v29 }
 0x139   : > { %5742 = vmatprep.mubr.msk.f32.mxu0 %vm301_vm1, %v4956_v14 }
 0x13b   : > { %5543 = vmatmul.mubr.msk.f32.gmra.mrb[30].mxu1 %vm301_vm1, %v7053_v1 }
 0x13c   : > { %5743 = vmatmul.mubr.msk.f32.gmra.mrb[30].mxu0 %vm301_vm1, %v4957_v20 }
 0x1b2   : > { %v5449_v22 = vpop.f32.mrb[0].mxu1 }
 0x1b3   : > { %v1831_v24 = vpop.f32.mrb[1].mxu1  ;;  %v5747_v56 = vadd.f32 %v5449_v22, %v7199_v53 }
 0x1b4   : > { %v5749_v57 = vadd.f32 %v7199_v53, %v1831_v24 }
 0x1b6   : > { %v5452_v26 = vpop.f32.mrb[2].mxu1 }
 0x1b7   : > { %v1841_v28 = vpop.f32.mrb[3].mxu1  ;;  %v5751_v63 = vadd.f32 %v5452_v26, %v7199_v53 }
 0x1b8   : > { %v5753_v0 = vadd.f32 %v7199_v53, %v1841_v28 }
 0x1ba   : > { %v5455_v32 = vpop.f32.mrb[4].mxu1 }
 0x1bb   : > { %v1851_v34 = vpop.f32.mrb[5].mxu1  ;;  %v5755_v5 = vadd.f32 %v5455_v32, %v7199_v53 }
 0x1bc   : > { %v5757_v7 = vadd.f32 %v7199_v53, %v1851_v34 }
 0x1be   : > { %v5458_v36 = vpop.f32.mrb[6].mxu1 }
 0x1bf   : > { %v1861_v46 = vpop.f32.mrb[7].mxu1  ;;  %v5759_v40 = vadd.f32 %v5458_v36, %v7199_v53 }
 0x1c0   : > { %v5761_v60 = vadd.f32 %v7199_v53, %v1861_v46 }
 0x1c2   : > { %v5461_v47 = vpop.f32.mrb[8].mxu1 }
 0x1c3   : > { %v1871_v48 = vpop.f32.mrb[9].mxu1  ;;  %v5763_v17 = vadd.f32 %v5461_v47, %v7199_v53 }
 0x1c4   : > { %v5765_v19 = vadd.f32 %v7199_v53, %v1871_v48 }
 0x1c6   : > { %v5464_v49 = vpop.f32.mrb[10].mxu1 }
 0x1c7   : > { %v1881_v50 = vpop.f32.mrb[11].mxu1  ;;  %v5767_v27 = vadd.f32 %v5464_v49, %v7199_v53 }
 0x1c8   : > { %v5769_v29 = vadd.f32 %v7199_v53, %v1881_v50 }
 0x1ca   : > { %v5467_v51 = vpop.f32.mrb[12].mxu1 }
 0x1cb   : > { %v1891_v52 = vpop.f32.mrb[13].mxu1  ;;  %v5771_v16 = vadd.f32 %v5467_v51, %v7199_v53 }
 0x1cc   : > { %v5773_v37 = vadd.f32 %v7199_v53, %v1891_v52 }
 0x1ce   : > { %v5470_v54 = vpop.f32.mrb[14].mxu1 }
 0x1cf   : > { %v1901_v55 = vpop.f32.mrb[15].mxu1  ;;  %v5775_v45 = vadd.f32 %v5470_v54, %v7199_v53 }
 0x1d0   : > { %v5777_v12 = vadd.f32 %v7199_v53, %v1901_v55 }
 0x1d3   : > { %v5699_v58 = vpop.f32.mrb[0].mxu0 }
 0x1d4   : > { %v5748_v59 = vadd.f32 %v5747_v56, %v5699_v58  ;;  %v4102_v61 = vpop.f32.mrb[1].mxu0 }
 0x1d5   : > { %v5750_v62 = vadd.f32 %v5749_v57, %v4102_v61 }
 0x1d6   : > { %4358 = vst [vmem:[%s7206_s9 + $0x8] sm:$0xff] %v5748_v59 }
 0x1d7   : > { %4357 = vst [vmem:[%s7206_s9] sm:$0xff] %v5750_v62  ;;  %v5702_v2 = vpop.f32.mrb[2].mxu0 }
 0x1d8   : > { %v5752_v3 = vadd.f32 %v5751_v63, %v5702_v2  ;;  %v4112_v4 = vpop.f32.mrb[3].mxu0 }
 0x1d9   : > { %v5754_v8 = vadd.f32 %v5753_v0, %v4112_v4 }
 0x1da   : > { %4360 = vst [vmem:[%s7206_s9 + $0x18] sm:$0xff] %v5752_v3 }
 0x1db   : > { %4359 = vst [vmem:[%s7206_s9 + $0x10] sm:$0xff] %v5754_v8  ;;  %v5705_v6 = vpop.f32.mrb[4].mxu0 }
 0x1dc   : > { %v5756_v44 = vadd.f32 %v5755_v5, %v5705_v6  ;;  %v4122_v30 = vpop.f32.mrb[5].mxu0 }
 0x1dd   : > { %v5758_v39 = vadd.f32 %v5757_v7, %v4122_v30 }
 0x1de   : > { %4362 = vst [vmem:[%s7206_s9 + $0x28] sm:$0xff] %v5756_v44 }
 0x1df   : > { %4361 = vst [vmem:[%s7206_s9 + $0x20] sm:$0xff] %v5758_v39  ;;  %v5708_v41 = vpop.f32.mrb[6].mxu0 }
 0x1e0   : > { %v5760_v9 = vadd.f32 %v5759_v40, %v5708_v41  ;;  %v4132_v13 = vpop.f32.mrb[7].mxu0 }
 0x1e1   : > { %v5762_v15 = vadd.f32 %v5761_v60, %v4132_v13 }
 0x1e2   : > { %4364 = vst [vmem:[%s7206_s9 + $0x38] sm:$0xff] %v5760_v9 }
 0x1e3   : > { %4363 = vst [vmem:[%s7206_s9 + $0x30] sm:$0xff] %v5762_v15  ;;  %v5711_v21 = vpop.f32.mrb[8].mxu0 }
 0x1e4   : > { %v5764_v23 = vadd.f32 %v5763_v17, %v5711_v21  ;;  %v4142_v25 = vpop.f32.mrb[9].mxu0 }
 0x1e5   : > { %v5766_v10 = vadd.f32 %v5765_v19, %v4142_v25 }
 0x1e6   : > { %4366 = vst [vmem:[%s7206_s9 + $0x48] sm:$0xff] %v5764_v23 }
 0x1e7   : > { %4365 = vst [vmem:[%s7206_s9 + $0x40] sm:$0xff] %v5766_v10  ;;  %v5714_v31 = vpop.f32.mrb[10].mxu0 }
 0x1e8   : > { %v5768_v33 = vadd.f32 %v5767_v27, %v5714_v31  ;;  %v4152_v1 = vpop.f32.mrb[11].mxu0 }
 0x1e9   : > { %v5770_v35 = vadd.f32 %v5769_v29, %v4152_v1 }
 0x1ea   : > { %4368 = vst [vmem:[%s7206_s9 + $0x58] sm:$0xff] %v5768_v33 }
 0x1eb   : > { %4367 = vst [vmem:[%s7206_s9 + $0x50] sm:$0xff] %v5770_v35  ;;  %v5717_v11 = vpop.f32.mrb[12].mxu0 }
 0x1ec   : > { %v5772_v38 = vadd.f32 %v5771_v16, %v5717_v11  ;;  %v4162_v42 = vpop.f32.mrb[13].mxu0 }
 0x1ed   : > { %v5774_v43 = vadd.f32 %v5773_v37, %v4162_v42 }
 0x1ee   : > { %4370 = vst [vmem:[%s7206_s9 + $0x68] sm:$0xff] %v5772_v38 }
 0x1ef   : > { %4369 = vst [vmem:[%s7206_s9 + $0x60] sm:$0xff] %v5774_v43  ;;  %v5720_v14 = vpop.f32.mrb[14].mxu0 }
 0x1f0   : > { %v5776_v18 = vadd.f32 %v5775_v45, %v5720_v14  ;;  %v4172_v20 = vpop.f32.mrb[15].mxu0 }
 0x1f1   : > { %v5778_v22 = vadd.f32 %v5777_v12, %v4172_v20 }
 0x1f2   : > { %4372 = vst [vmem:[%s7206_s9 + $0x78] sm:$0xff] %v5776_v18  ;;  %v5523_v24 = vpop.f32.mrb[16].mxu1 }
 0x1f3   : > { %4371 = vst [vmem:[%s7206_s9 + $0x70] sm:$0xff] %v5778_v22  ;;  %v5723_v26 = vpop.f32.mrb[16].mxu0  ;;  %v5779_v28 = vadd.f32 %v5523_v24, %v7199_v53  ;;  %v2365_v32 = vpop.f32.mrb[17].mxu1 }
 0x1f4   : > { %v4182_v34 = vpop.f32.mrb[17].mxu0  ;;  %v5781_v36 = vadd.f32 %v7199_v53, %v2365_v32 }
 0x1f5   : > { %v5780_v46 = vadd.f32 %v5779_v28, %v5723_v26 }
 0x1f6   : > { %v5782_v47 = vadd.f32 %v5781_v36, %v4182_v34  ;;  %v5526_v48 = vpop.f32.mrb[18].mxu1 }
 0x1f7   : > { %v5726_v49 = vpop.f32.mrb[18].mxu0  ;;  %4374 = vst [vmem:[%s7206_s9 + $0x88] sm:$0xff] %v5780_v46  ;;  %v5783_v50 = vadd.f32 %v5526_v48, %v7199_v53  ;;  %v2375_v51 = vpop.f32.mrb[19].mxu1 }
 0x1f8   : > { %v4192_v52 = vpop.f32.mrb[19].mxu0  ;;  %4373 = vst [vmem:[%s7206_s9 + $0x80] sm:$0xff] %v5782_v47  ;;  %v5785_v54 = vadd.f32 %v7199_v53, %v2375_v51 }
 0x1f9   : > { %v5784_v55 = vadd.f32 %v5783_v50, %v5726_v49 }
 0x1fa   : > { %v5786_v56 = vadd.f32 %v5785_v54, %v4192_v52  ;;  %v5529_v57 = vpop.f32.mrb[20].mxu1 }
 0x1fb   : > { %v5729_v58 = vpop.f32.mrb[20].mxu0  ;;  %4376 = vst [vmem:[%s7206_s9 + $0x98] sm:$0xff] %v5784_v55  ;;  %v5787_v59 = vadd.f32 %v5529_v57, %v7199_v53  ;;  %v2385_v61 = vpop.f32.mrb[21].mxu1 }
 0x1fc   : > { %v4202_v62 = vpop.f32.mrb[21].mxu0  ;;  %4375 = vst [vmem:[%s7206_s9 + $0x90] sm:$0xff] %v5786_v56  ;;  %v5789_v63 = vadd.f32 %v7199_v53, %v2385_v61 }
 0x1fd   : > { %v5788_v0 = vadd.f32 %v5787_v59, %v5729_v58 }
 0x1fe   : > { %v5790_v2 = vadd.f32 %v5789_v63, %v4202_v62  ;;  %v5532_v3 = vpop.f32.mrb[22].mxu1 }
 0x1ff   : > { %v5732_v4 = vpop.f32.mrb[22].mxu0  ;;  %4378 = vst [vmem:[%s7206_s9 + $0xa8] sm:$0xff] %v5788_v0  ;;  %v5791_v8 = vadd.f32 %v5532_v3, %v7199_v53  ;;  %v2395_v5 = vpop.f32.mrb[23].mxu1 }
 0x200   : > { %v4212_v7 = vpop.f32.mrb[23].mxu0  ;;  %4377 = vst [vmem:[%s7206_s9 + $0xa0] sm:$0xff] %v5790_v2  ;;  %v5793_v6 = vadd.f32 %v7199_v53, %v2395_v5 }
 0x201   : > { %v5792_v44 = vadd.f32 %v5791_v8, %v5732_v4 }
 0x202   : > { %v5794_v30 = vadd.f32 %v5793_v6, %v4212_v7  ;;  %v5535_v39 = vpop.f32.mrb[24].mxu1 }
 0x203   : > { %v5735_v40 = vpop.f32.mrb[24].mxu0  ;;  %4380 = vst [vmem:[%s7206_s9 + $0xb8] sm:$0xff] %v5792_v44  ;;  %v5795_v60 = vadd.f32 %v5535_v39, %v7199_v53  ;;  %v2405_v41 = vpop.f32.mrb[25].mxu1 }
 0x204   : > { %v4222_v9 = vpop.f32.mrb[25].mxu0  ;;  %4379 = vst [vmem:[%s7206_s9 + $0xb0] sm:$0xff] %v5794_v30  ;;  %v5797_v13 = vadd.f32 %v7199_v53, %v2405_v41 }
 0x205   : > { %v5796_v15 = vadd.f32 %v5795_v60, %v5735_v40 }
 0x206   : > { %v5798_v17 = vadd.f32 %v5797_v13, %v4222_v9  ;;  %v5538_v19 = vpop.f32.mrb[26].mxu1 }
 0x207   : > { %v5738_v21 = vpop.f32.mrb[26].mxu0  ;;  %4382 = vst [vmem:[%s7206_s9 + $0xc8] sm:$0xff] %v5796_v15  ;;  %v5799_v23 = vadd.f32 %v5538_v19, %v7199_v53  ;;  %v2415_v25 = vpop.f32.mrb[27].mxu1 }
 0x208   : > { %v4232_v10 = vpop.f32.mrb[27].mxu0  ;;  %4381 = vst [vmem:[%s7206_s9 + $0xc0] sm:$0xff] %v5798_v17  ;;  %v5801_v27 = vadd.f32 %v7199_v53, %v2415_v25 }
 0x209   : > { %v5800_v29 = vadd.f32 %v5799_v23, %v5738_v21 }
 0x20a   : > { %v5802_v31 = vadd.f32 %v5801_v27, %v4232_v10  ;;  %v5541_v33 = vpop.f32.mrb[28].mxu1 }
 0x20b   : > { %v5741_v1 = vpop.f32.mrb[28].mxu0  ;;  %4384 = vst [vmem:[%s7206_s9 + $0xd8] sm:$0xff] %v5800_v29  ;;  %v5803_v35 = vadd.f32 %v5541_v33, %v7199_v53  ;;  %v2425_v16 = vpop.f32.mrb[29].mxu1 }
 0x20c   : > { %v4242_v37 = vpop.f32.mrb[29].mxu0  ;;  %4383 = vst [vmem:[%s7206_s9 + $0xd0] sm:$0xff] %v5802_v31  ;;  %v5805_v11 = vadd.f32 %v7199_v53, %v2425_v16 }
 0x20d   : > { %v5804_v38 = vadd.f32 %v5803_v35, %v5741_v1 }
 0x20e   : > { %v5806_v42 = vadd.f32 %v5805_v11, %v4242_v37  ;;  %v5544_v43 = vpop.f32.mrb[30].mxu1 }
 0x20f   : > { %v5744_v45 = vpop.f32.mrb[30].mxu0  ;;  %4386 = vst [vmem:[%s7206_s9 + $0xe8] sm:$0xff] %v5804_v38  ;;  %v5807_v12 = vadd.f32 %v5544_v43, %v7199_v53  ;;  %v2435_v14 = vpop.f32.mrb[31].mxu1 }
 0x210   : > { %v4252_v18 = vpop.f32.mrb[31].mxu0  ;;  %4385 = vst [vmem:[%s7206_s9 + $0xe0] sm:$0xff] %v5806_v42  ;;  %v5809_v20 = vadd.f32 %v7199_v53, %v2435_v14 }
 0x211   : > { %v5808_v22 = vadd.f32 %v5807_v12, %v5744_v45 }
 0x212   : > { %v5810_v24 = vadd.f32 %v5809_v20, %v4252_v18 }
 0x213   : > { %4388 = vst [vmem:[%s7206_s9 + $0xf8] sm:$0xff] %v5808_v22 }
 0x214   : > { %4387 = vst [vmem:[%s7206_s9 + $0xf0] sm:$0xff] %v5810_v24 }
 0x215   : > { %6106 = shalt.err (!%p6103_p5)
}
 0x216   : > { %s6107_s29 = scalar_lea.hbm %s7272_s21, 4096  ;;  %s6111_s5 = scalar_lea.hbm %s7329_s3, 8192 }
 0x217   : > { %p6108_p6 = scmp.ne.s32.totalorder %s7272_s21, %s6107_s29  ;;  %p6112_p10 = scmp.lt.u32.totalorder %s7272_s21, %s7329_s3 }
 0x218   : > { %p6113_p11 = scmp.lt.u32.totalorder %s6111_s5, %s6107_s29  ;;  %p6115_p13 = scmp.lt.u32.totalorder %s6107_s29, %s7272_s21 }
 0x219   : > { %p6109_p7 = pnand %p6108_p6, %p6236_p4 }
 0x21a   : > { %p6114_p12 = por %p6113_p11, %p6112_p10 }
 0x21b   : > { %p6110_p9 = pneg %p6109_p7 }
 0x21c   : > { %p6116_p0 = por %p6115_p13, %p6114_p12 }
 0x21e   : > { %p6117_p1 = pnand %p6116_p0, %p6110_p9 }
 0x220   : > { %6120 = shalt.err (!%p6117_p1)
}
 0x221   : > { %s6174_s8 = smov 128   ;;  %s6175_s9 = smov 8  }
 0x222   : > { %6036 = dma.vmem_to_hbm [thread:$0]  (%p6236_p4), %s7274_s11, 4096, %s7272_s21, %s7280_s15, %s6174_s8, %s6174_s8, %s6175_s9  }
 0x223 PF: > { %p6042_p2 = scmp.ge.s32.totalorder %s6171_s17, 2  ;;  %s4420_s10 = sand.u32 1, %s6151_s12  }
 0x224   : > { %s4421_s18 = scalar_lea.sflag [#allocation4], %s4420_s10 }
 0x225   : > { %p6039_p3 = pnand %p6042_p2, %p6243_p8 }
 0x227   : > { %6146 = dma.done.wait (!%p6039_p3), %s4421_s18, 4096  }
 0x228   : > { %6148 = vsyncadd (!%p6039_p3), %s4421_s18, 4294963200  ;;  %s16_s17 = sadd.s32 1, %s6171_s17   ;;  %s7452_s12 = smov %s6155_s13 }
 0x229   : > { %p13_p5 = scmp.ge.s32.totalorder %s16_s17, 4   ;;  %s7453_s13 = smov %s6159_s14 }
 0x22a   : > { %s7454_s14 = smov %s6249_s25  ;;  %s7455_s15 = smov %s6167_s16 }
 0x22b   : > { %s7456_s16 = smov %s7458_s20  ;;  %15 = sbr.rel (!%p13_p5) target bundleno = 4 (0x4), region = 77 }
 0x232   :  { %4426 = vsyncpa [#allocation4], 1 }
 0x233   :  { %4428 = vsyncpa [#allocation4 + $0x1], 1 }

</bundles_post_ra>
